<compile_context>
chip_gen: v7x
topology: tpu7x:2x2x1
jax: 0.10.0
libtpu: 0.0.40
codegen_flags: <defaults>
</compile_context>

<pallas_src>
import functools

import jax
import jax.numpy as jnp
from jax.experimental import pallas as pl
from jax.experimental.pallas import tpu as pltpu


def _encoder_kernel(x_ref, wqkv_ref, wagg_ref, bagg_ref,
                    g1_ref, be1_ref, w1_ref, b1_ref, w2_ref, b2_ref,
                    g2_ref, be2_ref, o_ref, att_buf,
                    *, num_heads, seq_len, d_model, eps):
    f32 = jnp.float32
    bf16 = jnp.bfloat16

    S, D, H = seq_len, d_model, num_heads
    hs = D // H
    M = x_ref.shape[0]          # rows in this block (= block_b * S)
    TB = M // S                 # batch elements in this block

    x = x_ref[...].astype(f32)                  # (M, D)
    x_bf = x.astype(bf16)

    # --- Fused Q/K/V projection (scale already folded into the Q weights) ---
    qkv = jnp.dot(x_bf, wqkv_ref[...], preferred_element_type=f32)     # (M, 3D)
    qkv_bf = qkv.astype(bf16)                                          # cast once

    # --- Multi-head attention ---
    # Static loop over heads; per head the score / PV matmuls are batched over
    # the TB batch elements of this block.  Head outputs are written directly
    # into one (M, D) VMEM buffer so aggregation is a single full-depth matmul.
    for i in range(H):
        qh = qkv_bf[:, i * hs:(i + 1) * hs].reshape(TB, S, hs)
        kh = qkv_bf[:, D + i * hs:D + (i + 1) * hs].reshape(TB, S, hs)
        vh = qkv_bf[:, 2 * D + i * hs:2 * D + (i + 1) * hs].reshape(TB, S, hs)

        s = jnp.einsum('bqd,bkd->bqk', qh, kh,
                       preferred_element_type=f32)                     # (TB, S, S)
        s = s - jnp.max(s, axis=-1, keepdims=True)
        p = jnp.exp(s)
        p = p * pl.reciprocal(jnp.sum(p, axis=-1, keepdims=True), approx=True)
        oh = jnp.einsum('bqk,bkd->bqd', p.astype(bf16), vh,
                        preferred_element_type=f32)                    # (TB, S, hs)
        att_buf[:, i * hs:(i + 1) * hs] = oh.reshape(M, hs)

    # ONE (M, D) @ (D, D) aggregation matmul (full K=D contraction depth).
    att = jnp.dot(att_buf[...].astype(bf16), wagg_ref[...],
                  preferred_element_type=f32) + bagg_ref[...]          # (M, D)

    # --- Residual 1 + torch-style LayerNorm (unbiased std, eps added to std) ---
    y = x + att
    mean1 = jnp.mean(y, axis=-1, keepdims=True)
    c1 = y - mean1
    std1 = jnp.sqrt(jnp.sum(c1 * c1, axis=-1, keepdims=True) * (1.0 / (D - 1)))
    y = g1_ref[...] * c1 * (1.0 / (std1 + eps)) + be1_ref[...]

    # --- FeedForward: Linear -> ReLU -> Linear (dropout = identity) ---
    h = jnp.dot(y.astype(bf16), w1_ref[...], preferred_element_type=f32) + b1_ref[...]
    h = jnp.maximum(h, 0.0)
    ff = jnp.dot(h.astype(bf16), w2_ref[...], preferred_element_type=f32) + b2_ref[...]

    # --- Residual 2 + LayerNorm ---
    z = y + ff
    mean2 = jnp.mean(z, axis=-1, keepdims=True)
    c2 = z - mean2
    std2 = jnp.sqrt(jnp.sum(c2 * c2, axis=-1, keepdims=True) * (1.0 / (D - 1)))
    z = g2_ref[...] * c2 * (1.0 / (std2 + eps)) + be2_ref[...]

    o_ref[...] = z.astype(o_ref.dtype)


def _vmem_capacity_bytes():
    try:
        cap = getattr(pltpu.get_tpu_info(), "vmem_capacity_bytes", None)
        if cap:
            return int(cap)
    except Exception:
        pass
    return 64 * 1024 * 1024          # conservative (v7x-sized) fallback


def single_encoder(x, params, *, num_heads, eps=1e-6, block_b=None):
    B, S, D = x.shape
    dff = params["w1"].shape[1]

    vmem_cap = _vmem_capacity_bytes()
    # Leave headroom for compiler-internal scratch/semaphores; cap well under
    # physical VMEM (v7x: 64 MiB -> ~56 MiB; v5e/v6e: 128 MiB -> 112 MiB).
    vmem_limit = max(min(int(vmem_cap * 0.875), 112 * 1024 * 1024),
                     32 * 1024 * 1024)

    if block_b is None:
        # Bigger row tiles on 128-MiB-VMEM chips; always keep grid length >= 2
        # so both v7x TensorCores get work (harmless on 1-TC chips).
        target_rows = 512 if vmem_cap >= (96 << 20) else 256
        max_tb = max(1, target_rows // max(S, 1))
        if B >= 2:
            max_tb = min(max_tb, B // 2)
        max_tb = min(max_tb, B)
        block_b = 1
        for cand in range(1, max_tb + 1):
            if B % cand == 0:
                block_b = cand
    assert B % block_b == 0, "block_b must divide B"
    grid = (B // block_b,)
    rows = block_b * S

    # Pack Q/K/V weights into one (D, 3D) bf16 matrix; fold 1/sqrt(d_model)
    # into the Q columns (one-time weight transform, zero per-call cost).
    scale = 1.0 / (D ** 0.5)
    wqkv = jnp.concatenate(
        [params["wq"] * scale, params["wk"], params["wv"]], axis=1
    ).astype(jnp.bfloat16)
    wagg = params["wagg"].astype(jnp.bfloat16)
    w1 = params["w1"].astype(jnp.bfloat16)
    w2 = params["w2"].astype(jnp.bfloat16)

    # Flattened (B*S, D) row-major slab: no in-kernel (TB,S,D) reshapes.
    x2 = x.reshape(B * S, D)

    kernel = functools.partial(_encoder_kernel, num_heads=num_heads,
                               seq_len=S, d_model=D, eps=eps)

    operands = (x2, wqkv, wagg, params["bagg"], params["g1"], params["be1"],
                w1, params["b1"], w2, params["b2"], params["g2"], params["be2"])

    def build(weight_mode):
        def rep(shape):
            # Replicated (grid-invariant) block; optionally single-buffered.
            nd = len(shape)
            idx = lambda b, _n=nd: (0,) * _n
            if weight_mode is None:
                return pl.BlockSpec(shape, idx)
            return pl.BlockSpec(shape, idx, pipeline_mode=weight_mode)

        in_specs = [
            pl.BlockSpec((rows, D), lambda b: (b, 0)),   # x rows
            rep((D, 3 * D)),   # wqkv (bf16, scale folded into Q)
            rep((D, D)),       # wagg (bf16)
            rep((1, D)),       # bagg
            rep((1, D)),       # ln1 gamma
            rep((1, D)),       # ln1 beta
            rep((D, dff)),     # ff w1 (bf16)
            rep((1, dff)),     # ff b1
            rep((dff, D)),     # ff w2 (bf16)
            rep((1, D)),       # ff b2
            rep((1, D)),       # ln2 gamma
            rep((1, D)),       # ln2 beta
        ]
        return pl.pallas_call(
            kernel,
            out_shape=jax.ShapeDtypeStruct((B * S, D), jnp.float32),
            grid_spec=pltpu.PrefetchScalarGridSpec(
                num_scalar_prefetch=0,
                grid=grid,
                in_specs=in_specs,
                out_specs=pl.BlockSpec((rows, D), lambda b: (b, 0)),
                scratch_shapes=[pltpu.VMEM((rows, D), jnp.float32)],  # head outs
            ),
            compiler_params=pltpu.CompilerParams(
                dimension_semantics=("parallel",),
                vmem_limit_bytes=vmem_limit,
            ),
        )

    # Weights are grid-invariant -> single-buffer them (halves weight VMEM,
    # essential on v7x's 64 MiB).  Fall back to default double-buffering if the
    # installed Pallas rejects Buffered(1).
    try:
        out2 = build(pl.Buffered(1))(*operands)
    except Exception:
        out2 = build(None)(*operands)

    return out2.reshape(B, S, D)


def _reference(x, p, *, num_heads, eps=1e-6):
    """Pure-JAX f32 reference mirroring the PyTorch forward (dropout = identity)."""
    B, S, D = x.shape
    hs = D // num_heads
    Q = x @ p["wq"]; K = x @ p["wk"]; V = x @ p["wv"]
    heads = []
    for i in range(num_heads):
        qi = Q[..., i * hs:(i + 1) * hs]
        ki = K[..., i * hs:(i + 1) * hs]
        vi = V[..., i * hs:(i + 1) * hs]
        s = qi @ jnp.swapaxes(ki, -2, -1) / (D ** 0.5)
        heads.append(jax.nn.softmax(s, axis=-1) @ vi)
    att = jnp.concatenate(heads, axis=-1) @ p["wagg"] + p["bagg"]

    def ln(t, g, b):
        m = t.mean(-1, keepdims=True)
        std = jnp.sqrt(jnp.sum((t - m) ** 2, -1, keepdims=True) / (D - 1))
        return g * (t - m) / (std + eps) + b

    y = ln(x + att, p["g1"], p["be1"])
    ff = jnp.maximum(y @ p["w1"] + p["b1"], 0.0) @ p["w2"] + p["b2"]
    return ln(y + ff, p["g2"], p["be2"])


def make_params(key, d_model, dff):
    ks = jax.random.split(key, 8)
    scale = 0.05
    return {
        "wq": scale * jax.random.normal(ks[0], (d_model, d_model), jnp.float32),
        "wk": scale * jax.random.normal(ks[1], (d_model, d_model), jnp.float32),
        "wv": scale * jax.random.normal(ks[2], (d_model, d_model), jnp.float32),
        "wagg": scale * jax.random.normal(ks[3], (d_model, d_model), jnp.float32),
        "bagg": scale * jax.random.normal(ks[4], (1, d_model), jnp.float32),
        "g1": jnp.ones((1, d_model), jnp.float32),
        "be1": jnp.zeros((1, d_model), jnp.float32),
        "w1": scale * jax.random.normal(ks[5], (d_model, dff), jnp.float32),
        "b1": scale * jax.random.normal(ks[6], (1, dff), jnp.float32),
        "w2": scale * jax.random.normal(ks[7], (dff, d_model), jnp.float32),
        "b2": jnp.zeros((1, d_model), jnp.float32),
        "g2": jnp.ones((1, d_model), jnp.float32),
        "be2": jnp.zeros((1, d_model), jnp.float32),
    }


if __name__ == "__main__":
    B, S, d_model, dff, h = 2, 8, 32, 64, 4

    key = jax.random.PRNGKey(0)
    kx, kp = jax.random.split(key)
    x = jax.random.normal(kx, (B, S, d_model), jnp.float32)
    params = make_params(kp, d_model, dff)

    out = single_encoder(x, params, num_heads=h)
    out = jax.block_until_ready(out)

    ref = _reference(x, params, num_heads=h)
    assert out.shape == (B, S, d_model)
    # bf16 matmul inputs + approx softmax reciprocal vs. a pure-f32 reference.
    assert jnp.allclose(out, ref, atol=3e-2, rtol=3e-2), "mismatch vs reference"

    print("KERNEL_OK")
</pallas_src>

<mosaic_0001>
module attributes {stable_mosaic.version = 11 : i64} {
  func.func @_encoder_kernel(%arg0: i32, %arg1: memref<8x32xf32, #tpu.memory_space<vmem>>, %arg2: memref<32x96xbf16, #tpu.memory_space<vmem>>, %arg3: memref<32x32xbf16, #tpu.memory_space<vmem>>, %arg4: memref<1x32xf32, #tpu.memory_space<vmem>>, %arg5: memref<1x32xf32, #tpu.memory_space<vmem>>, %arg6: memref<1x32xf32, #tpu.memory_space<vmem>>, %arg7: memref<32x64xbf16, #tpu.memory_space<vmem>>, %arg8: memref<1x64xf32, #tpu.memory_space<vmem>>, %arg9: memref<64x32xbf16, #tpu.memory_space<vmem>>, %arg10: memref<1x32xf32, #tpu.memory_space<vmem>>, %arg11: memref<1x32xf32, #tpu.memory_space<vmem>>, %arg12: memref<1x32xf32, #tpu.memory_space<vmem>>, %arg13: memref<8x32xf32, #tpu.memory_space<vmem>>, %arg14: memref<8x32xf32, #tpu.memory_space<vmem>>) attributes {dimension_semantics = [#tpu.dimension_semantics<parallel>], iteration_bounds = array<i64: 2>, scalar_prefetch = 0 : i64, scratch_operands = 1 : i64, tpu.core_type = #tpu.core_type<tc>, window_params = [{transform_indices = @transform_0, window_bounds = array<i64: 8, 32>}, {pipeline_mode = #tpu.pipeline_mode<synchronous>, transform_indices = @transform_1, window_bounds = array<i64: 32, 96>}, {pipeline_mode = #tpu.pipeline_mode<synchronous>, transform_indices = @transform_2, window_bounds = array<i64: 32, 32>}, {pipeline_mode = #tpu.pipeline_mode<synchronous>, transform_indices = @transform_3, window_bounds = array<i64: 1, 32>}, {pipeline_mode = #tpu.pipeline_mode<synchronous>, transform_indices = @transform_4, window_bounds = array<i64: 1, 32>}, {pipeline_mode = #tpu.pipeline_mode<synchronous>, transform_indices = @transform_5, window_bounds = array<i64: 1, 32>}, {pipeline_mode = #tpu.pipeline_mode<synchronous>, transform_indices = @transform_6, window_bounds = array<i64: 32, 64>}, {pipeline_mode = #tpu.pipeline_mode<synchronous>, transform_indices = @transform_7, window_bounds = array<i64: 1, 64>}, {pipeline_mode = #tpu.pipeline_mode<synchronous>, transform_indices = @transform_8, window_bounds = array<i64: 64, 32>}, {pipeline_mode = #tpu.pipeline_mode<synchronous>, transform_indices = @transform_9, window_bounds = array<i64: 1, 32>}, {pipeline_mode = #tpu.pipeline_mode<synchronous>, transform_indices = @transform_10, window_bounds = array<i64: 1, 32>}, {pipeline_mode = #tpu.pipeline_mode<synchronous>, transform_indices = @transform_11, window_bounds = array<i64: 1, 32>}, {transform_indices = @transform_12, window_bounds = array<i64: 8, 32>}]} {
    %c0 = arith.constant 0 : index
    %c0_0 = arith.constant 0 : index
    %0 = vector.load %arg1[%c0, %c0_0] : memref<8x32xf32, #tpu.memory_space<vmem>>, vector<8x32xf32>
    %1 = arith.truncf %0 : vector<8x32xf32> to vector<8x32xbf16>
    %c0_1 = arith.constant 0 : index
    %c0_2 = arith.constant 0 : index
    %2 = vector.load %arg2[%c0_1, %c0_2] : memref<32x96xbf16, #tpu.memory_space<vmem>>, vector<32x96xbf16>
    %cst = arith.constant dense<0.000000e+00> : vector<8x96xf32>
    %3 = tpu.matmul %1, %2, %cst {dimension_numbers = #tpu.dot_dimension_numbers<[1], [0], [0], [1], [0, 0, 1, 1], [], []>} : vector<8x32xbf16>, vector<32x96xbf16>, vector<8x96xf32> -> vector<8x96xf32>
    %4 = arith.truncf %3 : vector<8x96xf32> to vector<8x96xbf16>
    %5 = vector.extract_strided_slice %4 {offsets = [0, 0], sizes = [8, 8], strides = [1, 1]} : vector<8x96xbf16> to vector<8x8xbf16>
    %6 = vector.shape_cast %5 : vector<8x8xbf16> to vector<1x8x8xbf16>
    %7 = vector.extract_strided_slice %4 {offsets = [0, 32], sizes = [8, 8], strides = [1, 1]} : vector<8x96xbf16> to vector<8x8xbf16>
    %8 = vector.shape_cast %7 : vector<8x8xbf16> to vector<1x8x8xbf16>
    %9 = vector.extract_strided_slice %4 {offsets = [0, 64], sizes = [8, 8], strides = [1, 1]} : vector<8x96xbf16> to vector<8x8xbf16>
    %10 = vector.shape_cast %9 : vector<8x8xbf16> to vector<1x8x8xbf16>
    "tpu.trace_start"() <{level = 10 : i32, message = "bqd,bkd->bqk"}> : () -> ()
    %cst_3 = arith.constant dense<0.000000e+00> : vector<1x8x8xf32>
    %11 = tpu.matmul %6, %8, %cst_3 {dimension_numbers = #tpu.dot_dimension_numbers<[2], [2], [1], [1], [0, 0, 0, 1, 1, 1], [0], [0]>} : vector<1x8x8xbf16>, vector<1x8x8xbf16>, vector<1x8x8xf32> -> vector<1x8x8xf32>
    "tpu.trace_stop"() : () -> ()
    %cst_4 = arith.constant dense<0xFF800000> : vector<1x8xf32>
    %12 = vector.multi_reduction <maximumf>, %11, %cst_4 [2] : vector<1x8x8xf32> to vector<1x8xf32>
    %13 = vector.shape_cast %12 : vector<1x8xf32> to vector<1x8x1xf32>
    %14 = vector.broadcast %13 : vector<1x8x1xf32> to vector<1x8x8xf32>
    %15 = arith.subf %11, %14 : vector<1x8x8xf32>
    %16 = math.exp %15 : vector<1x8x8xf32>
    %cst_5 = arith.constant dense<0.000000e+00> : vector<1x8xf32>
    %17 = vector.multi_reduction <add>, %16, %cst_5 [2] : vector<1x8x8xf32> to vector<1x8xf32>
    %18 = vector.shape_cast %17 : vector<1x8xf32> to vector<1x8x1xf32>
    %19 = tpu.reciprocal %18 {approx = true} : vector<1x8x1xf32> -> vector<1x8x1xf32>
    %20 = vector.broadcast %19 : vector<1x8x1xf32> to vector<1x8x8xf32>
    %21 = arith.mulf %16, %20 : vector<1x8x8xf32>
    %22 = arith.truncf %21 : vector<1x8x8xf32> to vector<1x8x8xbf16>
    "tpu.trace_start"() <{level = 10 : i32, message = "bqk,bkd->bqd"}> : () -> ()
    %cst_6 = arith.constant dense<0.000000e+00> : vector<1x8x8xf32>
    %23 = tpu.matmul %22, %10, %cst_6 {dimension_numbers = #tpu.dot_dimension_numbers<[2], [1], [1], [2], [0, 0, 0, 1, 1, 2], [0], [0]>} : vector<1x8x8xbf16>, vector<1x8x8xbf16>, vector<1x8x8xf32> -> vector<1x8x8xf32>
    "tpu.trace_stop"() : () -> ()
    %24 = vector.shape_cast %23 : vector<1x8x8xf32> to vector<8x8xf32>
    %c0_7 = arith.constant 0 : index
    %c0_8 = arith.constant 0 : index
    %25 = vector.load %arg14[%c0_7, %c0_8] : memref<8x32xf32, #tpu.memory_space<vmem>>, vector<8x8xf32>
    tpu.vector_store %arg14[%c0_7, %c0_8], %24 {strides = array<i32>} : memref<8x32xf32, #tpu.memory_space<vmem>>, vector<8x8xf32>,
    %26 = vector.extract_strided_slice %4 {offsets = [0, 8], sizes = [8, 8], strides = [1, 1]} : vector<8x96xbf16> to vector<8x8xbf16>
    %27 = vector.shape_cast %26 : vector<8x8xbf16> to vector<1x8x8xbf16>
    %28 = vector.extract_strided_slice %4 {offsets = [0, 40], sizes = [8, 8], strides = [1, 1]} : vector<8x96xbf16> to vector<8x8xbf16>
    %29 = vector.shape_cast %28 : vector<8x8xbf16> to vector<1x8x8xbf16>
    %30 = vector.extract_strided_slice %4 {offsets = [0, 72], sizes = [8, 8], strides = [1, 1]} : vector<8x96xbf16> to vector<8x8xbf16>
    %31 = vector.shape_cast %30 : vector<8x8xbf16> to vector<1x8x8xbf16>
    "tpu.trace_start"() <{level = 10 : i32, message = "bqd,bkd->bqk"}> : () -> ()
    %cst_9 = arith.constant dense<0.000000e+00> : vector<1x8x8xf32>
    %32 = tpu.matmul %27, %29, %cst_9 {dimension_numbers = #tpu.dot_dimension_numbers<[2], [2], [1], [1], [0, 0, 0, 1, 1, 1], [0], [0]>} : vector<1x8x8xbf16>, vector<1x8x8xbf16>, vector<1x8x8xf32> -> vector<1x8x8xf32>
    "tpu.trace_stop"() : () -> ()
    %cst_10 = arith.constant dense<0xFF800000> : vector<1x8xf32>
    %33 = vector.multi_reduction <maximumf>, %32, %cst_10 [2] : vector<1x8x8xf32> to vector<1x8xf32>
    %34 = vector.shape_cast %33 : vector<1x8xf32> to vector<1x8x1xf32>
    %35 = vector.broadcast %34 : vector<1x8x1xf32> to vector<1x8x8xf32>
    %36 = arith.subf %32, %35 : vector<1x8x8xf32>
    %37 = math.exp %36 : vector<1x8x8xf32>
    %cst_11 = arith.constant dense<0.000000e+00> : vector<1x8xf32>
    %38 = vector.multi_reduction <add>, %37, %cst_11 [2] : vector<1x8x8xf32> to vector<1x8xf32>
    %39 = vector.shape_cast %38 : vector<1x8xf32> to vector<1x8x1xf32>
    %40 = tpu.reciprocal %39 {approx = true} : vector<1x8x1xf32> -> vector<1x8x1xf32>
    %41 = vector.broadcast %40 : vector<1x8x1xf32> to vector<1x8x8xf32>
    %42 = arith.mulf %37, %41 : vector<1x8x8xf32>
    %43 = arith.truncf %42 : vector<1x8x8xf32> to vector<1x8x8xbf16>
    "tpu.trace_start"() <{level = 10 : i32, message = "bqk,bkd->bqd"}> : () -> ()
    %cst_12 = arith.constant dense<0.000000e+00> : vector<1x8x8xf32>
    %44 = tpu.matmul %43, %31, %cst_12 {dimension_numbers = #tpu.dot_dimension_numbers<[2], [1], [1], [2], [0, 0, 0, 1, 1, 2], [0], [0]>} : vector<1x8x8xbf16>, vector<1x8x8xbf16>, vector<1x8x8xf32> -> vector<1x8x8xf32>
    "tpu.trace_stop"() : () -> ()
    %45 = vector.shape_cast %44 : vector<1x8x8xf32> to vector<8x8xf32>
    %c0_13 = arith.constant 0 : index
    %c8 = arith.constant 8 : index
    %46 = vector.load %arg14[%c0_13, %c8] : memref<8x32xf32, #tpu.memory_space<vmem>>, vector<8x8xf32>
    tpu.vector_store %arg14[%c0_13, %c8], %45 {strides = array<i32>} : memref<8x32xf32, #tpu.memory_space<vmem>>, vector<8x8xf32>,
    %47 = vector.extract_strided_slice %4 {offsets = [0, 16], sizes = [8, 8], strides = [1, 1]} : vector<8x96xbf16> to vector<8x8xbf16>
    %48 = vector.shape_cast %47 : vector<8x8xbf16> to vector<1x8x8xbf16>
    %49 = vector.extract_strided_slice %4 {offsets = [0, 48], sizes = [8, 8], strides = [1, 1]} : vector<8x96xbf16> to vector<8x8xbf16>
    %50 = vector.shape_cast %49 : vector<8x8xbf16> to vector<1x8x8xbf16>
    %51 = vector.extract_strided_slice %4 {offsets = [0, 80], sizes = [8, 8], strides = [1, 1]} : vector<8x96xbf16> to vector<8x8xbf16>
    %52 = vector.shape_cast %51 : vector<8x8xbf16> to vector<1x8x8xbf16>
    "tpu.trace_start"() <{level = 10 : i32, message = "bqd,bkd->bqk"}> : () -> ()
    %cst_14 = arith.constant dense<0.000000e+00> : vector<1x8x8xf32>
    %53 = tpu.matmul %48, %50, %cst_14 {dimension_numbers = #tpu.dot_dimension_numbers<[2], [2], [1], [1], [0, 0, 0, 1, 1, 1], [0], [0]>} : vector<1x8x8xbf16>, vector<1x8x8xbf16>, vector<1x8x8xf32> -> vector<1x8x8xf32>
    "tpu.trace_stop"() : () -> ()
    %cst_15 = arith.constant dense<0xFF800000> : vector<1x8xf32>
    %54 = vector.multi_reduction <maximumf>, %53, %cst_15 [2] : vector<1x8x8xf32> to vector<1x8xf32>
    %55 = vector.shape_cast %54 : vector<1x8xf32> to vector<1x8x1xf32>
    %56 = vector.broadcast %55 : vector<1x8x1xf32> to vector<1x8x8xf32>
    %57 = arith.subf %53, %56 : vector<1x8x8xf32>
    %58 = math.exp %57 : vector<1x8x8xf32>
    %cst_16 = arith.constant dense<0.000000e+00> : vector<1x8xf32>
    %59 = vector.multi_reduction <add>, %58, %cst_16 [2] : vector<1x8x8xf32> to vector<1x8xf32>
    %60 = vector.shape_cast %59 : vector<1x8xf32> to vector<1x8x1xf32>
    %61 = tpu.reciprocal %60 {approx = true} : vector<1x8x1xf32> -> vector<1x8x1xf32>
    %62 = vector.broadcast %61 : vector<1x8x1xf32> to vector<1x8x8xf32>
    %63 = arith.mulf %58, %62 : vector<1x8x8xf32>
    %64 = arith.truncf %63 : vector<1x8x8xf32> to vector<1x8x8xbf16>
    "tpu.trace_start"() <{level = 10 : i32, message = "bqk,bkd->bqd"}> : () -> ()
    %cst_17 = arith.constant dense<0.000000e+00> : vector<1x8x8xf32>
    %65 = tpu.matmul %64, %52, %cst_17 {dimension_numbers = #tpu.dot_dimension_numbers<[2], [1], [1], [2], [0, 0, 0, 1, 1, 2], [0], [0]>} : vector<1x8x8xbf16>, vector<1x8x8xbf16>, vector<1x8x8xf32> -> vector<1x8x8xf32>
    "tpu.trace_stop"() : () -> ()
    %66 = vector.shape_cast %65 : vector<1x8x8xf32> to vector<8x8xf32>
    %c0_18 = arith.constant 0 : index
    %c16 = arith.constant 16 : index
    %67 = vector.load %arg14[%c0_18, %c16] : memref<8x32xf32, #tpu.memory_space<vmem>>, vector<8x8xf32>
    tpu.vector_store %arg14[%c0_18, %c16], %66 {strides = array<i32>} : memref<8x32xf32, #tpu.memory_space<vmem>>, vector<8x8xf32>,
    %68 = vector.extract_strided_slice %4 {offsets = [0, 24], sizes = [8, 8], strides = [1, 1]} : vector<8x96xbf16> to vector<8x8xbf16>
    %69 = vector.shape_cast %68 : vector<8x8xbf16> to vector<1x8x8xbf16>
    %70 = vector.extract_strided_slice %4 {offsets = [0, 56], sizes = [8, 8], strides = [1, 1]} : vector<8x96xbf16> to vector<8x8xbf16>
    %71 = vector.shape_cast %70 : vector<8x8xbf16> to vector<1x8x8xbf16>
    %72 = vector.extract_strided_slice %4 {offsets = [0, 88], sizes = [8, 8], strides = [1, 1]} : vector<8x96xbf16> to vector<8x8xbf16>
    %73 = vector.shape_cast %72 : vector<8x8xbf16> to vector<1x8x8xbf16>
    "tpu.trace_start"() <{level = 10 : i32, message = "bqd,bkd->bqk"}> : () -> ()
    %cst_19 = arith.constant dense<0.000000e+00> : vector<1x8x8xf32>
    %74 = tpu.matmul %69, %71, %cst_19 {dimension_numbers = #tpu.dot_dimension_numbers<[2], [2], [1], [1], [0, 0, 0, 1, 1, 1], [0], [0]>} : vector<1x8x8xbf16>, vector<1x8x8xbf16>, vector<1x8x8xf32> -> vector<1x8x8xf32>
    "tpu.trace_stop"() : () -> ()
    %cst_20 = arith.constant dense<0xFF800000> : vector<1x8xf32>
    %75 = vector.multi_reduction <maximumf>, %74, %cst_20 [2] : vector<1x8x8xf32> to vector<1x8xf32>
    %76 = vector.shape_cast %75 : vector<1x8xf32> to vector<1x8x1xf32>
    %77 = vector.broadcast %76 : vector<1x8x1xf32> to vector<1x8x8xf32>
    %78 = arith.subf %74, %77 : vector<1x8x8xf32>
    %79 = math.exp %78 : vector<1x8x8xf32>
    %cst_21 = arith.constant dense<0.000000e+00> : vector<1x8xf32>
    %80 = vector.multi_reduction <add>, %79, %cst_21 [2] : vector<1x8x8xf32> to vector<1x8xf32>
    %81 = vector.shape_cast %80 : vector<1x8xf32> to vector<1x8x1xf32>
    %82 = tpu.reciprocal %81 {approx = true} : vector<1x8x1xf32> -> vector<1x8x1xf32>
    %83 = vector.broadcast %82 : vector<1x8x1xf32> to vector<1x8x8xf32>
    %84 = arith.mulf %79, %83 : vector<1x8x8xf32>
    %85 = arith.truncf %84 : vector<1x8x8xf32> to vector<1x8x8xbf16>
    "tpu.trace_start"() <{level = 10 : i32, message = "bqk,bkd->bqd"}> : () -> ()
    %cst_22 = arith.constant dense<0.000000e+00> : vector<1x8x8xf32>
    %86 = tpu.matmul %85, %73, %cst_22 {dimension_numbers = #tpu.dot_dimension_numbers<[2], [1], [1], [2], [0, 0, 0, 1, 1, 2], [0], [0]>} : vector<1x8x8xbf16>, vector<1x8x8xbf16>, vector<1x8x8xf32> -> vector<1x8x8xf32>
    "tpu.trace_stop"() : () -> ()
    %87 = vector.shape_cast %86 : vector<1x8x8xf32> to vector<8x8xf32>
    %c0_23 = arith.constant 0 : index
    %c24 = arith.constant 24 : index
    %88 = vector.load %arg14[%c0_23, %c24] : memref<8x32xf32, #tpu.memory_space<vmem>>, vector<8x8xf32>
    tpu.vector_store %arg14[%c0_23, %c24], %87 {strides = array<i32>} : memref<8x32xf32, #tpu.memory_space<vmem>>, vector<8x8xf32>,
    %c0_24 = arith.constant 0 : index
    %c0_25 = arith.constant 0 : index
    %89 = vector.load %arg14[%c0_24, %c0_25] : memref<8x32xf32, #tpu.memory_space<vmem>>, vector<8x32xf32>
    %90 = arith.truncf %89 : vector<8x32xf32> to vector<8x32xbf16>
    %c0_26 = arith.constant 0 : index
    %c0_27 = arith.constant 0 : index
    %91 = vector.load %arg3[%c0_26, %c0_27] : memref<32x32xbf16, #tpu.memory_space<vmem>>, vector<32x32xbf16>
    %cst_28 = arith.constant dense<0.000000e+00> : vector<8x32xf32>
    %92 = tpu.matmul %90, %91, %cst_28 {dimension_numbers = #tpu.dot_dimension_numbers<[1], [0], [0], [1], [0, 0, 1, 1], [], []>} : vector<8x32xbf16>, vector<32x32xbf16>, vector<8x32xf32> -> vector<8x32xf32>
    %c0_29 = arith.constant 0 : index
    %c0_30 = arith.constant 0 : index
    %93 = vector.load %arg4[%c0_29, %c0_30] : memref<1x32xf32, #tpu.memory_space<vmem>>, vector<1x32xf32>
    %94 = vector.broadcast %93 : vector<1x32xf32> to vector<8x32xf32>
    %95 = arith.addf %92, %94 : vector<8x32xf32>
    %96 = arith.addf %0, %95 : vector<8x32xf32>
    %cst_31 = arith.constant dense<0.000000e+00> : vector<8xf32>
    %97 = vector.multi_reduction <add>, %96, %cst_31 [1] : vector<8x32xf32> to vector<8xf32>
    %98 = vector.shape_cast %97 : vector<8xf32> to vector<8x1xf32>
    %cst_32 = arith.constant 3.200000e+01 : f32
    %99 = vector.broadcast %cst_32 : f32 to vector<8x1xf32>
    %100 = arith.divf %98, %99 : vector<8x1xf32>
    %101 = vector.broadcast %100 : vector<8x1xf32> to vector<8x32xf32>
    %102 = arith.subf %96, %101 : vector<8x32xf32>
    %103 = arith.mulf %102, %102 : vector<8x32xf32>
    %cst_33 = arith.constant dense<0.000000e+00> : vector<8xf32>
    %104 = vector.multi_reduction <add>, %103, %cst_33 [1] : vector<8x32xf32> to vector<8xf32>
    %105 = vector.shape_cast %104 : vector<8xf32> to vector<8x1xf32>
    %cst_34 = arith.constant 0.0322580636 : f32
    %106 = vector.broadcast %cst_34 : f32 to vector<8x1xf32>
    %107 = arith.mulf %105, %106 : vector<8x1xf32>
    %108 = math.sqrt %107 : vector<8x1xf32>
    %c0_35 = arith.constant 0 : index
    %c0_36 = arith.constant 0 : index
    %109 = vector.load %arg5[%c0_35, %c0_36] : memref<1x32xf32, #tpu.memory_space<vmem>>, vector<1x32xf32>
    %110 = vector.broadcast %109 : vector<1x32xf32> to vector<8x32xf32>
    %111 = arith.mulf %110, %102 : vector<8x32xf32>
    %cst_37 = arith.constant 9.99999997E-7 : f32
    %112 = vector.broadcast %cst_37 : f32 to vector<8x1xf32>
    %113 = arith.addf %108, %112 : vector<8x1xf32>
    %cst_38 = arith.constant 1.000000e+00 : f32
    %114 = vector.broadcast %cst_38 : f32 to vector<8x1xf32>
    %115 = arith.divf %114, %113 : vector<8x1xf32>
    %116 = vector.broadcast %115 : vector<8x1xf32> to vector<8x32xf32>
    %117 = arith.mulf %111, %116 : vector<8x32xf32>
    %c0_39 = arith.constant 0 : index
    %c0_40 = arith.constant 0 : index
    %118 = vector.load %arg6[%c0_39, %c0_40] : memref<1x32xf32, #tpu.memory_space<vmem>>, vector<1x32xf32>
    %119 = vector.broadcast %118 : vector<1x32xf32> to vector<8x32xf32>
    %120 = arith.addf %117, %119 : vector<8x32xf32>
    %121 = arith.truncf %120 : vector<8x32xf32> to vector<8x32xbf16>
    %c0_41 = arith.constant 0 : index
    %c0_42 = arith.constant 0 : index
    %122 = vector.load %arg7[%c0_41, %c0_42] : memref<32x64xbf16, #tpu.memory_space<vmem>>, vector<32x64xbf16>
    %cst_43 = arith.constant dense<0.000000e+00> : vector<8x64xf32>
    %123 = tpu.matmul %121, %122, %cst_43 {dimension_numbers = #tpu.dot_dimension_numbers<[1], [0], [0], [1], [0, 0, 1, 1], [], []>} : vector<8x32xbf16>, vector<32x64xbf16>, vector<8x64xf32> -> vector<8x64xf32>
    %c0_44 = arith.constant 0 : index
    %c0_45 = arith.constant 0 : index
    %124 = vector.load %arg8[%c0_44, %c0_45] : memref<1x64xf32, #tpu.memory_space<vmem>>, vector<1x64xf32>
    %125 = vector.broadcast %124 : vector<1x64xf32> to vector<8x64xf32>
    %126 = arith.addf %123, %125 : vector<8x64xf32>
    %cst_46 = arith.constant 0.000000e+00 : f32
    %127 = vector.broadcast %cst_46 : f32 to vector<8x64xf32>
    %128 = arith.maximumf %126, %127 : vector<8x64xf32>
    %129 = arith.truncf %128 : vector<8x64xf32> to vector<8x64xbf16>
    %c0_47 = arith.constant 0 : index
    %c0_48 = arith.constant 0 : index
    %130 = vector.load %arg9[%c0_47, %c0_48] : memref<64x32xbf16, #tpu.memory_space<vmem>>, vector<64x32xbf16>
    %cst_49 = arith.constant dense<0.000000e+00> : vector<8x32xf32>
    %131 = tpu.matmul %129, %130, %cst_49 {dimension_numbers = #tpu.dot_dimension_numbers<[1], [0], [0], [1], [0, 0, 1, 1], [], []>} : vector<8x64xbf16>, vector<64x32xbf16>, vector<8x32xf32> -> vector<8x32xf32>
    %c0_50 = arith.constant 0 : index
    %c0_51 = arith.constant 0 : index
    %132 = vector.load %arg10[%c0_50, %c0_51] : memref<1x32xf32, #tpu.memory_space<vmem>>, vector<1x32xf32>
    %133 = vector.broadcast %132 : vector<1x32xf32> to vector<8x32xf32>
    %134 = arith.addf %131, %133 : vector<8x32xf32>
    %135 = arith.addf %120, %134 : vector<8x32xf32>
    %cst_52 = arith.constant dense<0.000000e+00> : vector<8xf32>
    %136 = vector.multi_reduction <add>, %135, %cst_52 [1] : vector<8x32xf32> to vector<8xf32>
    %137 = vector.shape_cast %136 : vector<8xf32> to vector<8x1xf32>
    %cst_53 = arith.constant 3.200000e+01 : f32
    %138 = vector.broadcast %cst_53 : f32 to vector<8x1xf32>
    %139 = arith.divf %137, %138 : vector<8x1xf32>
    %140 = vector.broadcast %139 : vector<8x1xf32> to vector<8x32xf32>
    %141 = arith.subf %135, %140 : vector<8x32xf32>
    %142 = arith.mulf %141, %141 : vector<8x32xf32>
    %cst_54 = arith.constant dense<0.000000e+00> : vector<8xf32>
    %143 = vector.multi_reduction <add>, %142, %cst_54 [1] : vector<8x32xf32> to vector<8xf32>
    %144 = vector.shape_cast %143 : vector<8xf32> to vector<8x1xf32>
    %cst_55 = arith.constant 0.0322580636 : f32
    %145 = vector.broadcast %cst_55 : f32 to vector<8x1xf32>
    %146 = arith.mulf %144, %145 : vector<8x1xf32>
    %147 = math.sqrt %146 : vector<8x1xf32>
    %c0_56 = arith.constant 0 : index
    %c0_57 = arith.constant 0 : index
    %148 = vector.load %arg11[%c0_56, %c0_57] : memref<1x32xf32, #tpu.memory_space<vmem>>, vector<1x32xf32>
    %149 = vector.broadcast %148 : vector<1x32xf32> to vector<8x32xf32>
    %150 = arith.mulf %149, %141 : vector<8x32xf32>
    %cst_58 = arith.constant 9.99999997E-7 : f32
    %151 = vector.broadcast %cst_58 : f32 to vector<8x1xf32>
    %152 = arith.addf %147, %151 : vector<8x1xf32>
    %cst_59 = arith.constant 1.000000e+00 : f32
    %153 = vector.broadcast %cst_59 : f32 to vector<8x1xf32>
    %154 = arith.divf %153, %152 : vector<8x1xf32>
    %155 = vector.broadcast %154 : vector<8x1xf32> to vector<8x32xf32>
    %156 = arith.mulf %150, %155 : vector<8x32xf32>
    %c0_60 = arith.constant 0 : index
    %c0_61 = arith.constant 0 : index
    %157 = vector.load %arg12[%c0_60, %c0_61] : memref<1x32xf32, #tpu.memory_space<vmem>>, vector<1x32xf32>
    %158 = vector.broadcast %157 : vector<1x32xf32> to vector<8x32xf32>
    %159 = arith.addf %156, %158 : vector<8x32xf32>
    %c0_62 = arith.constant 0 : index
    %c0_63 = arith.constant 0 : index
    %160 = vector.load %arg13[%c0_62, %c0_63] : memref<8x32xf32, #tpu.memory_space<vmem>>, vector<8x32xf32>
    tpu.vector_store %arg13[%c0_62, %c0_63], %159 {strides = array<i32>} : memref<8x32xf32, #tpu.memory_space<vmem>>, vector<8x32xf32>,
    return
  }
  func.func @transform_0(%arg0: i32) -> (i32, i32) {
    %c0_i32 = arith.constant 0 : i32
    %c0_i32_0 = arith.constant 0 : i32
    return %arg0, %c0_i32 : i32, i32
  }
  func.func @transform_1(%arg0: i32) -> (i32, i32) {
    %c0_i32 = arith.constant 0 : i32
    %c0_i32_0 = arith.constant 0 : i32
    %c0_i32_1 = arith.constant 0 : i32
    return %c0_i32, %c0_i32_0 : i32, i32
  }
  func.func @transform_2(%arg0: i32) -> (i32, i32) {
    %c0_i32 = arith.constant 0 : i32
    %c0_i32_0 = arith.constant 0 : i32
    %c0_i32_1 = arith.constant 0 : i32
    return %c0_i32, %c0_i32_0 : i32, i32
  }
  func.func @transform_3(%arg0: i32) -> (i32, i32) {
    %c0_i32 = arith.constant 0 : i32
    %c0_i32_0 = arith.constant 0 : i32
    %c0_i32_1 = arith.constant 0 : i32
    return %c0_i32, %c0_i32_0 : i32, i32
  }
  func.func @transform_4(%arg0: i32) -> (i32, i32) {
    %c0_i32 = arith.constant 0 : i32
    %c0_i32_0 = arith.constant 0 : i32
    %c0_i32_1 = arith.constant 0 : i32
    return %c0_i32, %c0_i32_0 : i32, i32
  }
  func.func @transform_5(%arg0: i32) -> (i32, i32) {
    %c0_i32 = arith.constant 0 : i32
    %c0_i32_0 = arith.constant 0 : i32
    %c0_i32_1 = arith.constant 0 : i32
    return %c0_i32, %c0_i32_0 : i32, i32
  }
  func.func @transform_6(%arg0: i32) -> (i32, i32) {
    %c0_i32 = arith.constant 0 : i32
    %c0_i32_0 = arith.constant 0 : i32
    %c0_i32_1 = arith.constant 0 : i32
    return %c0_i32, %c0_i32_0 : i32, i32
  }
  func.func @transform_7(%arg0: i32) -> (i32, i32) {
    %c0_i32 = arith.constant 0 : i32
    %c0_i32_0 = arith.constant 0 : i32
    %c0_i32_1 = arith.constant 0 : i32
    return %c0_i32, %c0_i32_0 : i32, i32
  }
  func.func @transform_8(%arg0: i32) -> (i32, i32) {
    %c0_i32 = arith.constant 0 : i32
    %c0_i32_0 = arith.constant 0 : i32
    %c0_i32_1 = arith.constant 0 : i32
    return %c0_i32, %c0_i32_0 : i32, i32
  }
  func.func @transform_9(%arg0: i32) -> (i32, i32) {
    %c0_i32 = arith.constant 0 : i32
    %c0_i32_0 = arith.constant 0 : i32
    %c0_i32_1 = arith.constant 0 : i32
    return %c0_i32, %c0_i32_0 : i32, i32
  }
  func.func @transform_10(%arg0: i32) -> (i32, i32) {
    %c0_i32 = arith.constant 0 : i32
    %c0_i32_0 = arith.constant 0 : i32
    %c0_i32_1 = arith.constant 0 : i32
    return %c0_i32, %c0_i32_0 : i32, i32
  }
  func.func @transform_11(%arg0: i32) -> (i32, i32) {
    %c0_i32 = arith.constant 0 : i32
    %c0_i32_0 = arith.constant 0 : i32
    %c0_i32_1 = arith.constant 0 : i32
    return %c0_i32, %c0_i32_0 : i32, i32
  }
  func.func @transform_12(%arg0: i32) -> (i32, i32) {
    %c0_i32 = arith.constant 0 : i32
    %c0_i32_0 = arith.constant 0 : i32
    return %arg0, %c0_i32 : i32, i32
  }
}

module attributes {stable_mosaic.version = 11 : i64} {
  func.func @_encoder_kernel(%arg0: i32, %arg1: memref<8x32xf32, #tpu.memory_space<vmem>>, %arg2: memref<32x96xbf16, #tpu.memory_space<vmem>>, %arg3: memref<32x32xbf16, #tpu.memory_space<vmem>>, %arg4: memref<1x32xf32, #tpu.memory_space<vmem>>, %arg5: memref<1x32xf32, #tpu.memory_space<vmem>>, %arg6: memref<1x32xf32, #tpu.memory_space<vmem>>, %arg7: memref<32x64xbf16, #tpu.memory_space<vmem>>, %arg8: memref<1x64xf32, #tpu.memory_space<vmem>>, %arg9: memref<64x32xbf16, #tpu.memory_space<vmem>>, %arg10: memref<1x32xf32, #tpu.memory_space<vmem>>, %arg11: memref<1x32xf32, #tpu.memory_space<vmem>>, %arg12: memref<1x32xf32, #tpu.memory_space<vmem>>, %arg13: memref<8x32xf32, #tpu.memory_space<vmem>>, %arg14: memref<8x32xf32, #tpu.memory_space<vmem>>) attributes {dimension_semantics = [#tpu.dimension_semantics<parallel>], iteration_bounds = array<i64: 2>, scalar_prefetch = 0 : i64, scratch_operands = 1 : i64, tpu.core_type = #tpu.core_type<tc>, window_params = [{transform_indices = @transform_0, window_bounds = array<i64: 8, 32>}, {pipeline_mode = #tpu.pipeline_mode<synchronous>, transform_indices = @transform_1, window_bounds = array<i64: 32, 96>}, {pipeline_mode = #tpu.pipeline_mode<synchronous>, transform_indices = @transform_2, window_bounds = array<i64: 32, 32>}, {pipeline_mode = #tpu.pipeline_mode<synchronous>, transform_indices = @transform_3, window_bounds = array<i64: 1, 32>}, {pipeline_mode = #tpu.pipeline_mode<synchronous>, transform_indices = @transform_4, window_bounds = array<i64: 1, 32>}, {pipeline_mode = #tpu.pipeline_mode<synchronous>, transform_indices = @transform_5, window_bounds = array<i64: 1, 32>}, {pipeline_mode = #tpu.pipeline_mode<synchronous>, transform_indices = @transform_6, window_bounds = array<i64: 32, 64>}, {pipeline_mode = #tpu.pipeline_mode<synchronous>, transform_indices = @transform_7, window_bounds = array<i64: 1, 64>}, {pipeline_mode = #tpu.pipeline_mode<synchronous>, transform_indices = @transform_8, window_bounds = array<i64: 64, 32>}, {pipeline_mode = #tpu.pipeline_mode<synchronous>, transform_indices = @transform_9, window_bounds = array<i64: 1, 32>}, {pipeline_mode = #tpu.pipeline_mode<synchronous>, transform_indices = @transform_10, window_bounds = array<i64: 1, 32>}, {pipeline_mode = #tpu.pipeline_mode<synchronous>, transform_indices = @transform_11, window_bounds = array<i64: 1, 32>}, {transform_indices = @transform_12, window_bounds = array<i64: 8, 32>}]} {
    %c0 = arith.constant 0 : index
    %c0_0 = arith.constant 0 : index
    %0 = vector.load %arg1[%c0, %c0_0] : memref<8x32xf32, #tpu.memory_space<vmem>>, vector<8x32xf32>
    %1 = arith.truncf %0 : vector<8x32xf32> to vector<8x32xbf16>
    %c0_1 = arith.constant 0 : index
    %c0_2 = arith.constant 0 : index
    %2 = vector.load %arg2[%c0_1, %c0_2] : memref<32x96xbf16, #tpu.memory_space<vmem>>, vector<32x96xbf16>
    %cst = arith.constant dense<0.000000e+00> : vector<8x96xf32>
    %3 = tpu.matmul %1, %2, %cst {dimension_numbers = #tpu.dot_dimension_numbers<[1], [0], [0], [1], [0, 0, 1, 1], [], []>} : vector<8x32xbf16>, vector<32x96xbf16>, vector<8x96xf32> -> vector<8x96xf32>
    %4 = arith.truncf %3 : vector<8x96xf32> to vector<8x96xbf16>
    %5 = vector.extract_strided_slice %4 {offsets = [0, 0], sizes = [8, 8], strides = [1, 1]} : vector<8x96xbf16> to vector<8x8xbf16>
    %6 = vector.shape_cast %5 : vector<8x8xbf16> to vector<1x8x8xbf16>
    %7 = vector.extract_strided_slice %4 {offsets = [0, 32], sizes = [8, 8], strides = [1, 1]} : vector<8x96xbf16> to vector<8x8xbf16>
    %8 = vector.shape_cast %7 : vector<8x8xbf16> to vector<1x8x8xbf16>
    %9 = vector.extract_strided_slice %4 {offsets = [0, 64], sizes = [8, 8], strides = [1, 1]} : vector<8x96xbf16> to vector<8x8xbf16>
    %10 = vector.shape_cast %9 : vector<8x8xbf16> to vector<1x8x8xbf16>
    "tpu.trace_start"() <{level = 10 : i32, message = "bqd,bkd->bqk"}> : () -> ()
    %cst_3 = arith.constant dense<0.000000e+00> : vector<1x8x8xf32>
    %11 = tpu.matmul %6, %8, %cst_3 {dimension_numbers = #tpu.dot_dimension_numbers<[2], [2], [1], [1], [0, 0, 0, 1, 1, 1], [0], [0]>} : vector<1x8x8xbf16>, vector<1x8x8xbf16>, vector<1x8x8xf32> -> vector<1x8x8xf32>
    "tpu.trace_stop"() : () -> ()
    %cst_4 = arith.constant dense<0xFF800000> : vector<1x8xf32>
    %12 = vector.multi_reduction <maximumf>, %11, %cst_4 [2] : vector<1x8x8xf32> to vector<1x8xf32>
    %13 = vector.shape_cast %12 : vector<1x8xf32> to vector<1x8x1xf32>
    %14 = vector.broadcast %13 : vector<1x8x1xf32> to vector<1x8x8xf32>
    %15 = arith.subf %11, %14 : vector<1x8x8xf32>
    %16 = math.exp %15 : vector<1x8x8xf32>
    %cst_5 = arith.constant dense<0.000000e+00> : vector<1x8xf32>
    %17 = vector.multi_reduction <add>, %16, %cst_5 [2] : vector<1x8x8xf32> to vector<1x8xf32>
    %18 = vector.shape_cast %17 : vector<1x8xf32> to vector<1x8x1xf32>
    %19 = tpu.reciprocal %18 {approx = true} : vector<1x8x1xf32> -> vector<1x8x1xf32>
    %20 = vector.broadcast %19 : vector<1x8x1xf32> to vector<1x8x8xf32>
    %21 = arith.mulf %16, %20 : vector<1x8x8xf32>
    %22 = arith.truncf %21 : vector<1x8x8xf32> to vector<1x8x8xbf16>
    "tpu.trace_start"() <{level = 10 : i32, message = "bqk,bkd->bqd"}> : () -> ()
    %cst_6 = arith.constant dense<0.000000e+00> : vector<1x8x8xf32>
    %23 = tpu.matmul %22, %10, %cst_6 {dimension_numbers = #tpu.dot_dimension_numbers<[2], [1], [1], [2], [0, 0, 0, 1, 1, 2], [0], [0]>} : vector<1x8x8xbf16>, vector<1x8x8xbf16>, vector<1x8x8xf32> -> vector<1x8x8xf32>
    "tpu.trace_stop"() : () -> ()
    %24 = vector.shape_cast %23 : vector<1x8x8xf32> to vector<8x8xf32>
    %c0_7 = arith.constant 0 : index
    %c0_8 = arith.constant 0 : index
    %25 = vector.load %arg14[%c0_7, %c0_8] : memref<8x32xf32, #tpu.memory_space<vmem>>, vector<8x8xf32>
    tpu.vector_store %arg14[%c0_7, %c0_8], %24 {strides = array<i32>} : memref<8x32xf32, #tpu.memory_space<vmem>>, vector<8x8xf32>,
    %26 = vector.extract_strided_slice %4 {offsets = [0, 8], sizes = [8, 8], strides = [1, 1]} : vector<8x96xbf16> to vector<8x8xbf16>
    %27 = vector.shape_cast %26 : vector<8x8xbf16> to vector<1x8x8xbf16>
    %28 = vector.extract_strided_slice %4 {offsets = [0, 40], sizes = [8, 8], strides = [1, 1]} : vector<8x96xbf16> to vector<8x8xbf16>
    %29 = vector.shape_cast %28 : vector<8x8xbf16> to vector<1x8x8xbf16>
    %30 = vector.extract_strided_slice %4 {offsets = [0, 72], sizes = [8, 8], strides = [1, 1]} : vector<8x96xbf16> to vector<8x8xbf16>
    %31 = vector.shape_cast %30 : vector<8x8xbf16> to vector<1x8x8xbf16>
    "tpu.trace_start"() <{level = 10 : i32, message = "bqd,bkd->bqk"}> : () -> ()
    %cst_9 = arith.constant dense<0.000000e+00> : vector<1x8x8xf32>
    %32 = tpu.matmul %27, %29, %cst_9 {dimension_numbers = #tpu.dot_dimension_numbers<[2], [2], [1], [1], [0, 0, 0, 1, 1, 1], [0], [0]>} : vector<1x8x8xbf16>, vector<1x8x8xbf16>, vector<1x8x8xf32> -> vector<1x8x8xf32>
    "tpu.trace_stop"() : () -> ()
    %cst_10 = arith.constant dense<0xFF800000> : vector<1x8xf32>
    %33 = vector.multi_reduction <maximumf>, %32, %cst_10 [2] : vector<1x8x8xf32> to vector<1x8xf32>
    %34 = vector.shape_cast %33 : vector<1x8xf32> to vector<1x8x1xf32>
    %35 = vector.broadcast %34 : vector<1x8x1xf32> to vector<1x8x8xf32>
    %36 = arith.subf %32, %35 : vector<1x8x8xf32>
    %37 = math.exp %36 : vector<1x8x8xf32>
    %cst_11 = arith.constant dense<0.000000e+00> : vector<1x8xf32>
    %38 = vector.multi_reduction <add>, %37, %cst_11 [2] : vector<1x8x8xf32> to vector<1x8xf32>
    %39 = vector.shape_cast %38 : vector<1x8xf32> to vector<1x8x1xf32>
    %40 = tpu.reciprocal %39 {approx = true} : vector<1x8x1xf32> -> vector<1x8x1xf32>
    %41 = vector.broadcast %40 : vector<1x8x1xf32> to vector<1x8x8xf32>
    %42 = arith.mulf %37, %41 : vector<1x8x8xf32>
    %43 = arith.truncf %42 : vector<1x8x8xf32> to vector<1x8x8xbf16>
    "tpu.trace_start"() <{level = 10 : i32, message = "bqk,bkd->bqd"}> : () -> ()
    %cst_12 = arith.constant dense<0.000000e+00> : vector<1x8x8xf32>
    %44 = tpu.matmul %43, %31, %cst_12 {dimension_numbers = #tpu.dot_dimension_numbers<[2], [1], [1], [2], [0, 0, 0, 1, 1, 2], [0], [0]>} : vector<1x8x8xbf16>, vector<1x8x8xbf16>, vector<1x8x8xf32> -> vector<1x8x8xf32>
    "tpu.trace_stop"() : () -> ()
    %45 = vector.shape_cast %44 : vector<1x8x8xf32> to vector<8x8xf32>
    %c0_13 = arith.constant 0 : index
    %c8 = arith.constant 8 : index
    %46 = vector.load %arg14[%c0_13, %c8] : memref<8x32xf32, #tpu.memory_space<vmem>>, vector<8x8xf32>
    tpu.vector_store %arg14[%c0_13, %c8], %45 {strides = array<i32>} : memref<8x32xf32, #tpu.memory_space<vmem>>, vector<8x8xf32>,
    %47 = vector.extract_strided_slice %4 {offsets = [0, 16], sizes = [8, 8], strides = [1, 1]} : vector<8x96xbf16> to vector<8x8xbf16>
    %48 = vector.shape_cast %47 : vector<8x8xbf16> to vector<1x8x8xbf16>
    %49 = vector.extract_strided_slice %4 {offsets = [0, 48], sizes = [8, 8], strides = [1, 1]} : vector<8x96xbf16> to vector<8x8xbf16>
    %50 = vector.shape_cast %49 : vector<8x8xbf16> to vector<1x8x8xbf16>
    %51 = vector.extract_strided_slice %4 {offsets = [0, 80], sizes = [8, 8], strides = [1, 1]} : vector<8x96xbf16> to vector<8x8xbf16>
    %52 = vector.shape_cast %51 : vector<8x8xbf16> to vector<1x8x8xbf16>
    "tpu.trace_start"() <{level = 10 : i32, message = "bqd,bkd->bqk"}> : () -> ()
    %cst_14 = arith.constant dense<0.000000e+00> : vector<1x8x8xf32>
    %53 = tpu.matmul %48, %50, %cst_14 {dimension_numbers = #tpu.dot_dimension_numbers<[2], [2], [1], [1], [0, 0, 0, 1, 1, 1], [0], [0]>} : vector<1x8x8xbf16>, vector<1x8x8xbf16>, vector<1x8x8xf32> -> vector<1x8x8xf32>
    "tpu.trace_stop"() : () -> ()
    %cst_15 = arith.constant dense<0xFF800000> : vector<1x8xf32>
    %54 = vector.multi_reduction <maximumf>, %53, %cst_15 [2] : vector<1x8x8xf32> to vector<1x8xf32>
    %55 = vector.shape_cast %54 : vector<1x8xf32> to vector<1x8x1xf32>
    %56 = vector.broadcast %55 : vector<1x8x1xf32> to vector<1x8x8xf32>
    %57 = arith.subf %53, %56 : vector<1x8x8xf32>
    %58 = math.exp %57 : vector<1x8x8xf32>
    %cst_16 = arith.constant dense<0.000000e+00> : vector<1x8xf32>
    %59 = vector.multi_reduction <add>, %58, %cst_16 [2] : vector<1x8x8xf32> to vector<1x8xf32>
    %60 = vector.shape_cast %59 : vector<1x8xf32> to vector<1x8x1xf32>
    %61 = tpu.reciprocal %60 {approx = true} : vector<1x8x1xf32> -> vector<1x8x1xf32>
    %62 = vector.broadcast %61 : vector<1x8x1xf32> to vector<1x8x8xf32>
    %63 = arith.mulf %58, %62 : vector<1x8x8xf32>
    %64 = arith.truncf %63 : vector<1x8x8xf32> to vector<1x8x8xbf16>
    "tpu.trace_start"() <{level = 10 : i32, message = "bqk,bkd->bqd"}> : () -> ()
    %cst_17 = arith.constant dense<0.000000e+00> : vector<1x8x8xf32>
    %65 = tpu.matmul %64, %52, %cst_17 {dimension_numbers = #tpu.dot_dimension_numbers<[2], [1], [1], [2], [0, 0, 0, 1, 1, 2], [0], [0]>} : vector<1x8x8xbf16>, vector<1x8x8xbf16>, vector<1x8x8xf32> -> vector<1x8x8xf32>
    "tpu.trace_stop"() : () -> ()
    %66 = vector.shape_cast %65 : vector<1x8x8xf32> to vector<8x8xf32>
    %c0_18 = arith.constant 0 : index
    %c16 = arith.constant 16 : index
    %67 = vector.load %arg14[%c0_18, %c16] : memref<8x32xf32, #tpu.memory_space<vmem>>, vector<8x8xf32>
    tpu.vector_store %arg14[%c0_18, %c16], %66 {strides = array<i32>} : memref<8x32xf32, #tpu.memory_space<vmem>>, vector<8x8xf32>,
    %68 = vector.extract_strided_slice %4 {offsets = [0, 24], sizes = [8, 8], strides = [1, 1]} : vector<8x96xbf16> to vector<8x8xbf16>
    %69 = vector.shape_cast %68 : vector<8x8xbf16> to vector<1x8x8xbf16>
    %70 = vector.extract_strided_slice %4 {offsets = [0, 56], sizes = [8, 8], strides = [1, 1]} : vector<8x96xbf16> to vector<8x8xbf16>
    %71 = vector.shape_cast %70 : vector<8x8xbf16> to vector<1x8x8xbf16>
    %72 = vector.extract_strided_slice %4 {offsets = [0, 88], sizes = [8, 8], strides = [1, 1]} : vector<8x96xbf16> to vector<8x8xbf16>
    %73 = vector.shape_cast %72 : vector<8x8xbf16> to vector<1x8x8xbf16>
    "tpu.trace_start"() <{level = 10 : i32, message = "bqd,bkd->bqk"}> : () -> ()
    %cst_19 = arith.constant dense<0.000000e+00> : vector<1x8x8xf32>
    %74 = tpu.matmul %69, %71, %cst_19 {dimension_numbers = #tpu.dot_dimension_numbers<[2], [2], [1], [1], [0, 0, 0, 1, 1, 1], [0], [0]>} : vector<1x8x8xbf16>, vector<1x8x8xbf16>, vector<1x8x8xf32> -> vector<1x8x8xf32>
    "tpu.trace_stop"() : () -> ()
    %cst_20 = arith.constant dense<0xFF800000> : vector<1x8xf32>
    %75 = vector.multi_reduction <maximumf>, %74, %cst_20 [2] : vector<1x8x8xf32> to vector<1x8xf32>
    %76 = vector.shape_cast %75 : vector<1x8xf32> to vector<1x8x1xf32>
    %77 = vector.broadcast %76 : vector<1x8x1xf32> to vector<1x8x8xf32>
    %78 = arith.subf %74, %77 : vector<1x8x8xf32>
    %79 = math.exp %78 : vector<1x8x8xf32>
    %cst_21 = arith.constant dense<0.000000e+00> : vector<1x8xf32>
    %80 = vector.multi_reduction <add>, %79, %cst_21 [2] : vector<1x8x8xf32> to vector<1x8xf32>
    %81 = vector.shape_cast %80 : vector<1x8xf32> to vector<1x8x1xf32>
    %82 = tpu.reciprocal %81 {approx = true} : vector<1x8x1xf32> -> vector<1x8x1xf32>
    %83 = vector.broadcast %82 : vector<1x8x1xf32> to vector<1x8x8xf32>
    %84 = arith.mulf %79, %83 : vector<1x8x8xf32>
    %85 = arith.truncf %84 : vector<1x8x8xf32> to vector<1x8x8xbf16>
    "tpu.trace_start"() <{level = 10 : i32, message = "bqk,bkd->bqd"}> : () -> ()
    %cst_22 = arith.constant dense<0.000000e+00> : vector<1x8x8xf32>
    %86 = tpu.matmul %85, %73, %cst_22 {dimension_numbers = #tpu.dot_dimension_numbers<[2], [1], [1], [2], [0, 0, 0, 1, 1, 2], [0], [0]>} : vector<1x8x8xbf16>, vector<1x8x8xbf16>, vector<1x8x8xf32> -> vector<1x8x8xf32>
    "tpu.trace_stop"() : () -> ()
    %87 = vector.shape_cast %86 : vector<1x8x8xf32> to vector<8x8xf32>
    %c0_23 = arith.constant 0 : index
    %c24 = arith.constant 24 : index
    %88 = vector.load %arg14[%c0_23, %c24] : memref<8x32xf32, #tpu.memory_space<vmem>>, vector<8x8xf32>
    tpu.vector_store %arg14[%c0_23, %c24], %87 {strides = array<i32>} : memref<8x32xf32, #tpu.memory_space<vmem>>, vector<8x8xf32>,
    %c0_24 = arith.constant 0 : index
    %c0_25 = arith.constant 0 : index
    %89 = vector.load %arg14[%c0_24, %c0_25] : memref<8x32xf32, #tpu.memory_space<vmem>>, vector<8x32xf32>
    %90 = arith.truncf %89 : vector<8x32xf32> to vector<8x32xbf16>
    %c0_26 = arith.constant 0 : index
    %c0_27 = arith.constant 0 : index
    %91 = vector.load %arg3[%c0_26, %c0_27] : memref<32x32xbf16, #tpu.memory_space<vmem>>, vector<32x32xbf16>
    %cst_28 = arith.constant dense<0.000000e+00> : vector<8x32xf32>
    %92 = tpu.matmul %90, %91, %cst_28 {dimension_numbers = #tpu.dot_dimension_numbers<[1], [0], [0], [1], [0, 0, 1, 1], [], []>} : vector<8x32xbf16>, vector<32x32xbf16>, vector<8x32xf32> -> vector<8x32xf32>
    %c0_29 = arith.constant 0 : index
    %c0_30 = arith.constant 0 : index
    %93 = vector.load %arg4[%c0_29, %c0_30] : memref<1x32xf32, #tpu.memory_space<vmem>>, vector<1x32xf32>
    %94 = vector.broadcast %93 : vector<1x32xf32> to vector<8x32xf32>
    %95 = arith.addf %92, %94 : vector<8x32xf32>
    %96 = arith.addf %0, %95 : vector<8x32xf32>
    %cst_31 = arith.constant dense<0.000000e+00> : vector<8xf32>
    %97 = vector.multi_reduction <add>, %96, %cst_31 [1] : vector<8x32xf32> to vector<8xf32>
    %98 = vector.shape_cast %97 : vector<8xf32> to vector<8x1xf32>
    %cst_32 = arith.constant 3.200000e+01 : f32
    %99 = vector.broadcast %cst_32 : f32 to vector<8x1xf32>
    %100 = arith.divf %98, %99 : vector<8x1xf32>
    %101 = vector.broadcast %100 : vector<8x1xf32> to vector<8x32xf32>
    %102 = arith.subf %96, %101 : vector<8x32xf32>
    %103 = arith.mulf %102, %102 : vector<8x32xf32>
    %cst_33 = arith.constant dense<0.000000e+00> : vector<8xf32>
    %104 = vector.multi_reduction <add>, %103, %cst_33 [1] : vector<8x32xf32> to vector<8xf32>
    %105 = vector.shape_cast %104 : vector<8xf32> to vector<8x1xf32>
    %cst_34 = arith.constant 0.0322580636 : f32
    %106 = vector.broadcast %cst_34 : f32 to vector<8x1xf32>
    %107 = arith.mulf %105, %106 : vector<8x1xf32>
    %108 = math.sqrt %107 : vector<8x1xf32>
    %c0_35 = arith.constant 0 : index
    %c0_36 = arith.constant 0 : index
    %109 = vector.load %arg5[%c0_35, %c0_36] : memref<1x32xf32, #tpu.memory_space<vmem>>, vector<1x32xf32>
    %110 = vector.broadcast %109 : vector<1x32xf32> to vector<8x32xf32>
    %111 = arith.mulf %110, %102 : vector<8x32xf32>
    %cst_37 = arith.constant 9.99999997E-7 : f32
    %112 = vector.broadcast %cst_37 : f32 to vector<8x1xf32>
    %113 = arith.addf %108, %112 : vector<8x1xf32>
    %cst_38 = arith.constant 1.000000e+00 : f32
    %114 = vector.broadcast %cst_38 : f32 to vector<8x1xf32>
    %115 = arith.divf %114, %113 : vector<8x1xf32>
    %116 = vector.broadcast %115 : vector<8x1xf32> to vector<8x32xf32>
    %117 = arith.mulf %111, %116 : vector<8x32xf32>
    %c0_39 = arith.constant 0 : index
    %c0_40 = arith.constant 0 : index
    %118 = vector.load %arg6[%c0_39, %c0_40] : memref<1x32xf32, #tpu.memory_space<vmem>>, vector<1x32xf32>
    %119 = vector.broadcast %118 : vector<1x32xf32> to vector<8x32xf32>
    %120 = arith.addf %117, %119 : vector<8x32xf32>
    %121 = arith.truncf %120 : vector<8x32xf32> to vector<8x32xbf16>
    %c0_41 = arith.constant 0 : index
    %c0_42 = arith.constant 0 : index
    %122 = vector.load %arg7[%c0_41, %c0_42] : memref<32x64xbf16, #tpu.memory_space<vmem>>, vector<32x64xbf16>
    %cst_43 = arith.constant dense<0.000000e+00> : vector<8x64xf32>
    %123 = tpu.matmul %121, %122, %cst_43 {dimension_numbers = #tpu.dot_dimension_numbers<[1], [0], [0], [1], [0, 0, 1, 1], [], []>} : vector<8x32xbf16>, vector<32x64xbf16>, vector<8x64xf32> -> vector<8x64xf32>
    %c0_44 = arith.constant 0 : index
    %c0_45 = arith.constant 0 : index
    %124 = vector.load %arg8[%c0_44, %c0_45] : memref<1x64xf32, #tpu.memory_space<vmem>>, vector<1x64xf32>
    %125 = vector.broadcast %124 : vector<1x64xf32> to vector<8x64xf32>
    %126 = arith.addf %123, %125 : vector<8x64xf32>
    %cst_46 = arith.constant 0.000000e+00 : f32
    %127 = vector.broadcast %cst_46 : f32 to vector<8x64xf32>
    %128 = arith.maximumf %126, %127 : vector<8x64xf32>
    %129 = arith.truncf %128 : vector<8x64xf32> to vector<8x64xbf16>
    %c0_47 = arith.constant 0 : index
    %c0_48 = arith.constant 0 : index
    %130 = vector.load %arg9[%c0_47, %c0_48] : memref<64x32xbf16, #tpu.memory_space<vmem>>, vector<64x32xbf16>
    %cst_49 = arith.constant dense<0.000000e+00> : vector<8x32xf32>
    %131 = tpu.matmul %129, %130, %cst_49 {dimension_numbers = #tpu.dot_dimension_numbers<[1], [0], [0], [1], [0, 0, 1, 1], [], []>} : vector<8x64xbf16>, vector<64x32xbf16>, vector<8x32xf32> -> vector<8x32xf32>
    %c0_50 = arith.constant 0 : index
    %c0_51 = arith.constant 0 : index
    %132 = vector.load %arg10[%c0_50, %c0_51] : memref<1x32xf32, #tpu.memory_space<vmem>>, vector<1x32xf32>
    %133 = vector.broadcast %132 : vector<1x32xf32> to vector<8x32xf32>
    %134 = arith.addf %131, %133 : vector<8x32xf32>
    %135 = arith.addf %120, %134 : vector<8x32xf32>
    %cst_52 = arith.constant dense<0.000000e+00> : vector<8xf32>
    %136 = vector.multi_reduction <add>, %135, %cst_52 [1] : vector<8x32xf32> to vector<8xf32>
    %137 = vector.shape_cast %136 : vector<8xf32> to vector<8x1xf32>
    %cst_53 = arith.constant 3.200000e+01 : f32
    %138 = vector.broadcast %cst_53 : f32 to vector<8x1xf32>
    %139 = arith.divf %137, %138 : vector<8x1xf32>
    %140 = vector.broadcast %139 : vector<8x1xf32> to vector<8x32xf32>
    %141 = arith.subf %135, %140 : vector<8x32xf32>
    %142 = arith.mulf %141, %141 : vector<8x32xf32>
    %cst_54 = arith.constant dense<0.000000e+00> : vector<8xf32>
    %143 = vector.multi_reduction <add>, %142, %cst_54 [1] : vector<8x32xf32> to vector<8xf32>
    %144 = vector.shape_cast %143 : vector<8xf32> to vector<8x1xf32>
    %cst_55 = arith.constant 0.0322580636 : f32
    %145 = vector.broadcast %cst_55 : f32 to vector<8x1xf32>
    %146 = arith.mulf %144, %145 : vector<8x1xf32>
    %147 = math.sqrt %146 : vector<8x1xf32>
    %c0_56 = arith.constant 0 : index
    %c0_57 = arith.constant 0 : index
    %148 = vector.load %arg11[%c0_56, %c0_57] : memref<1x32xf32, #tpu.memory_space<vmem>>, vector<1x32xf32>
    %149 = vector.broadcast %148 : vector<1x32xf32> to vector<8x32xf32>
    %150 = arith.mulf %149, %141 : vector<8x32xf32>
    %cst_58 = arith.constant 9.99999997E-7 : f32
    %151 = vector.broadcast %cst_58 : f32 to vector<8x1xf32>
    %152 = arith.addf %147, %151 : vector<8x1xf32>
    %cst_59 = arith.constant 1.000000e+00 : f32
    %153 = vector.broadcast %cst_59 : f32 to vector<8x1xf32>
    %154 = arith.divf %153, %152 : vector<8x1xf32>
    %155 = vector.broadcast %154 : vector<8x1xf32> to vector<8x32xf32>
    %156 = arith.mulf %150, %155 : vector<8x32xf32>
    %c0_60 = arith.constant 0 : index
    %c0_61 = arith.constant 0 : index
    %157 = vector.load %arg12[%c0_60, %c0_61] : memref<1x32xf32, #tpu.memory_space<vmem>>, vector<1x32xf32>
    %158 = vector.broadcast %157 : vector<1x32xf32> to vector<8x32xf32>
    %159 = arith.addf %156, %158 : vector<8x32xf32>
    %c0_62 = arith.constant 0 : index
    %c0_63 = arith.constant 0 : index
    %160 = vector.load %arg13[%c0_62, %c0_63] : memref<8x32xf32, #tpu.memory_space<vmem>>, vector<8x32xf32>
    tpu.vector_store %arg13[%c0_62, %c0_63], %159 {strides = array<i32>} : memref<8x32xf32, #tpu.memory_space<vmem>>, vector<8x32xf32>,
    return
  }
  func.func @transform_0(%arg0: i32) -> (i32, i32) {
    %c0_i32 = arith.constant 0 : i32
    %c0_i32_0 = arith.constant 0 : i32
    return %arg0, %c0_i32 : i32, i32
  }
  func.func @transform_1(%arg0: i32) -> (i32, i32) {
    %c0_i32 = arith.constant 0 : i32
    %c0_i32_0 = arith.constant 0 : i32
    %c0_i32_1 = arith.constant 0 : i32
    return %c0_i32, %c0_i32_0 : i32, i32
  }
  func.func @transform_2(%arg0: i32) -> (i32, i32) {
    %c0_i32 = arith.constant 0 : i32
    %c0_i32_0 = arith.constant 0 : i32
    %c0_i32_1 = arith.constant 0 : i32
    return %c0_i32, %c0_i32_0 : i32, i32
  }
  func.func @transform_3(%arg0: i32) -> (i32, i32) {
    %c0_i32 = arith.constant 0 : i32
    %c0_i32_0 = arith.constant 0 : i32
    %c0_i32_1 = arith.constant 0 : i32
    return %c0_i32, %c0_i32_0 : i32, i32
  }
  func.func @transform_4(%arg0: i32) -> (i32, i32) {
    %c0_i32 = arith.constant 0 : i32
    %c0_i32_0 = arith.constant 0 : i32
    %c0_i32_1 = arith.constant 0 : i32
    return %c0_i32, %c0_i32_0 : i32, i32
  }
  func.func @transform_5(%arg0: i32) -> (i32, i32) {
    %c0_i32 = arith.constant 0 : i32
    %c0_i32_0 = arith.constant 0 : i32
    %c0_i32_1 = arith.constant 0 : i32
    return %c0_i32, %c0_i32_0 : i32, i32
  }
  func.func @transform_6(%arg0: i32) -> (i32, i32) {
    %c0_i32 = arith.constant 0 : i32
    %c0_i32_0 = arith.constant 0 : i32
    %c0_i32_1 = arith.constant 0 : i32
    return %c0_i32, %c0_i32_0 : i32, i32
  }
  func.func @transform_7(%arg0: i32) -> (i32, i32) {
    %c0_i32 = arith.constant 0 : i32
    %c0_i32_0 = arith.constant 0 : i32
    %c0_i32_1 = arith.constant 0 : i32
    return %c0_i32, %c0_i32_0 : i32, i32
  }
  func.func @transform_8(%arg0: i32) -> (i32, i32) {
    %c0_i32 = arith.constant 0 : i32
    %c0_i32_0 = arith.constant 0 : i32
    %c0_i32_1 = arith.constant 0 : i32
    return %c0_i32, %c0_i32_0 : i32, i32
  }
  func.func @transform_9(%arg0: i32) -> (i32, i32) {
    %c0_i32 = arith.constant 0 : i32
    %c0_i32_0 = arith.constant 0 : i32
    %c0_i32_1 = arith.constant 0 : i32
    return %c0_i32, %c0_i32_0 : i32, i32
  }
  func.func @transform_10(%arg0: i32) -> (i32, i32) {
    %c0_i32 = arith.constant 0 : i32
    %c0_i32_0 = arith.constant 0 : i32
    %c0_i32_1 = arith.constant 0 : i32
    return %c0_i32, %c0_i32_0 : i32, i32
  }
  func.func @transform_11(%arg0: i32) -> (i32, i32) {
    %c0_i32 = arith.constant 0 : i32
    %c0_i32_0 = arith.constant 0 : i32
    %c0_i32_1 = arith.constant 0 : i32
    return %c0_i32, %c0_i32_0 : i32, i32
  }
  func.func @transform_12(%arg0: i32) -> (i32, i32) {
    %c0_i32 = arith.constant 0 : i32
    %c0_i32_0 = arith.constant 0 : i32
    return %arg0, %c0_i32 : i32, i32
  }
}

</mosaic_0001>

<bundles_post_ra>
// kernel: tpu_custom_call.1
= control target key start
LH: loop header
LB: loop body
LE: loop exit
PB: predicated region body
PF: predicated region fallthrough
CT: control target
= control target key end

     0   :  { %s2043_s0 = inlined_call_operand.vmem [shape: f32[16,32], index: 0, kind: input, shape index: {}]   ;;  %s2044_s1 = inlined_call_operand.vmem [shape: bf16[32,96], index: 1, kind: input, shape index: {}]   ;;  %s2045_s2 = inlined_call_operand.vmem [shape: bf16[32,32], index: 2, kind: input, shape index: {}]   ;;  %s2046_s3 = inlined_call_operand.vmem [shape: f32[1,32], index: 3, kind: input, shape index: {}]   ;;  %s2047_s4 = inlined_call_operand.vmem [shape: f32[1,32], index: 4, kind: input, shape index: {}]   ;;  %s2048_s5 = inlined_call_operand.vmem [shape: f32[1,32], index: 5, kind: input, shape index: {}]   ;;  %s2049_s6 = inlined_call_operand.hbm [shape: bf16[32,64], index: 6, kind: input, shape index: {}]   ;;  %s2050_s7 = inlined_call_operand.vmem [shape: f32[1,64], index: 7, kind: input, shape index: {}]   ;;  %s2051_s8 = inlined_call_operand.vmem [shape: bf16[64,32], index: 8, kind: input, shape index: {}]   ;;  %s2052_s9 = inlined_call_operand.vmem [shape: f32[1,32], index: 9, kind: input, shape index: {}]   ;;  %s2053_s10 = inlined_call_operand.vmem [shape: f32[1,32], index: 10, kind: input, shape index: {}]   ;;  %s2054_s11 = inlined_call_operand.vmem [shape: f32[1,32], index: 11, kind: input, shape index: {}]   ;;  %s2055_s12 = inlined_call_operand.hbm [shape: f32[16,32], index: 12, kind: output, shape index: {}]  }
   0x1   :  { %2060 = sst [smem:[#allocation11_spill]] %s2043_s0 }
   0x2   :  { %17 = vsyncpa [#allocation4], 0 }
   0x3   :  { %18 = vsyncpa [#allocation5], 0 }
   0x4   :  { %20 = vsyncpa [#allocation5 + $0x1], 0  ;;  %s1769_s21 = smov 0   ;;  %s1771_s22 = smov 0  }
   0x5   :  { %s1773_s23 = smov 0   ;;  %s1775_s24 = smov 0  }
   0x6 LB: > { %2061 = sst [smem:[#allocation9_spill]] %s1678_s23  ;;  %s1790_s25 = sadd.s32 4294967295, %s1682_s24   ;;  %s1682_s24 = sphi %s1775_s24, %s2077_s24   ;;  %s1678_s23 = sphi %s1773_s23, %s2074_s23   ;;  %s1674_s22 = sphi %s1771_s22, %s2076_s22   ;;  %s1670_s21 = sphi %s1769_s21, %s2075_s21  }
   0x7   : > { %s1331_s26 = sadd.s32 4294967294, %s1682_s24   ;;  %s1794_s27 = sadd.s32 1, %s1682_s24  }
   0x8   : > { %s290_s28 = sadd.s32 1, %s1678_s23  ;;  %s287_s29 = ssub.s32 %s1682_s24, %s1794_s27 }
   0x9   : > { %p300_p0 = scmp.ne.s32.totalorder %s1678_s23, %s1674_s22  ;;  %p288_p1 = scmp.eq.s32.totalorder %s287_s29, 0 }
   0xa   : > { %p301_p2 = scmp.eq.s32.totalorder %s1790_s25, 1  ;;  %p306_p3 = scmp.ne.s32.totalorder %s1674_s22, %s1670_s21 }
   0xb   : > { %p307_p4 = scmp.eq.s32.totalorder %s1331_s26, 1  ;;  %p1332_p7 = scmp.ge.s32.totalorder %s1682_s24, 1 }
   0xc   : > { %s1805_s30 = scalar_select %p288_p1, %s1678_s23, %s290_s28  }
   0xd   : > { %p1807_p5 = por %p301_p2, %p300_p0  ;;  %p1811_p6 = por %p307_p4, %p306_p3 }
   0xe   : > { %2062 = sst [smem:[#allocation10_spill]] %s1805_s30  ;;  %p314_p8 = scmp.lt.s32.totalorder %s1682_s24, 3 }
   0xf   : > { %s2063_s13 = scalar_select %p1807_p5, 1, 0 }
  0x10   : > { %s2064_s14 = scalar_select %p1811_p6, 1, 0 }
  0x11   : > { %p2057_p9 = scmp.eq.s32.totalorder %s1790_s25, 0  ;;  %p1818_p10 = pnand %p1332_p7, %p314_p8 }
  0x12   : > { %s1684_s16 = smov [#allocation3]   ;;  %s1588_s26 = scalar_lea.hbm %s2049_s6, 256 }
  0x13   : > { %s2065_s15 = scalar_select %p1818_p10, 1, 0 }
  0x14   : > { %s341_s17 = sshll.u32 %s1684_s16, 4  ;;  %p1492_p11 = pneg %p1818_p10  ;;  %s342_s17 = int_to_ptr.vmem [resolvable:$true] %s341_s17 }
  0x15   : > { %p1589_p13 = scmp.ne.s32.totalorder %s2049_s6, %s1588_s26  ;;  %p1595_p3 = scmp.lt.u32.totalorder %s1588_s26, %s2049_s6 }
  0x16   : > { %p1826_p12 = pnand %p2057_p9, %p1492_p11 }
  0x18   : > { %p1590_p0 = pneg %p1826_p12 }
  0x1a   : > { %p1591_p1 = pnand %p1590_p0, %p1589_p13 }
  0x1c   : > { %p1592_p2 = pneg %p1591_p1 }
  0x1e   : > { %p1597_p4 = pnand %p1595_p3, %p1592_p2 }
  0x20   : > { %1600 = shalt.err (!%p1597_p4)
}
  0x21   : > { %s1601_s23 = scalar_lea.vmem %s342_s17, 256  ;;  %p1609_p9 = scmp.lt.s32.totalorder %s342_s17, %s342_s17 }
  0x22   : > { %p1602_p7 = scmp.ne.s32.totalorder %s342_s17, %s1601_s23  ;;  %p1610_p6 = scmp.lt.s32.totalorder %s1601_s23, %s1601_s23 }
  0x24   : > { %p1604_p8 = pnand %p1602_p7, %p1590_p0  ;;  %p1611_p5 = por %p1610_p6, %p1609_p9 }
  0x26   : > { %p1605_p11 = pneg %p1604_p8 }
  0x28   : > { %p1612_p10 = pnand %p1611_p5, %p1605_p11 }
  0x2a   : > { %1615 = shalt.err (!%p1612_p10)
}
  0x2b   : > { %s1685_s19 = smov 64   ;;  %s1686_s20 = smov 4  }
  0x2c   : > { %1495 = dma.hbm_to_vmem [thread:$0]  (!%p1826_p12), %s2049_s6, 256, %s342_s17, [#allocation4], %s1685_s19, %s1685_s19, %s1686_s20  }
  0x2d   : > { %p2067_p13 = scmp.ne.s32.totalorder %s2065_s15, 0 }
  0x2e   : > { %p2068_p1 = scmp.eq.s32.totalorder (!%p2067_p13), %s1790_s25, 0 }
  0x2f   : > { %379 = sbr.rel (%p2067_p13) target bundleno = 2647 (0xa57), region = 68 }
  0x36   : > { %1661 = dma.done.wait (%p2068_p1), [#allocation4], 256   ;;  %p2069_p0 = pmov %p2068_p1 }
  0x37   : > { %p420_p5 = scmp.lt.s32.totalorder %s1790_s25, 1  ;;  %v1687_v0 = vmov 0.0   ;;  %vm1688_vm0 = vmmov 0   ;;  %s2070_s0 = sld [smem:[#allocation11_spill]]  ;;  %v1554_v1 = vld [vmem:[%s2044_s1] sm:$0xff]   ;;  %v1555_v2 = vld [vmem:[%s2044_s1 + $0x8] sm:$0xff]  }
  0x38   : > { %1663 = vsyncadd (%p2069_p0), [#allocation4], 4294967040  ;;  %1402 = vmatprep.subr.bf16.mxu0 %v1687_v0  ;;  %1406 = vmatprep.mubr.msk.bf16.mxu0 %vm1688_vm0, %v1687_v0  ;;  %vm443_vm1 = vcmask 261120   ;;  %s1689_s28 = smov 120   ;;  %s1690_s29 = smov 96   ;;  %vm491_vm2 = vcmask 64512  }
  0x39   : > { %s421_s23 = scalar_select %p420_p5, %s1790_s25, 1  ;;  %1410 = vmatprep.subr.bf16.mxu1 %v1687_v0  ;;  %1412 = vmatprep.mubr.msk.bf16.mxu1 %vm1688_vm0, %v1687_v0  ;;  %vm555_vm3 = vcmask 1043456   ;;  %vm714_vm4 = vcmask 130112   ;;  %vm830_vm5 = vcmask 195712   ;;  %vm946_vm6 = vcmask 261312  }
  0x3a   : > { %1403 = vmatpush3.bf16.msra.mxu0 %v1554_v1  ;;  %s1693_s15 = smov 72   ;;  %s1694_s17 = smov 112   ;;  %vm1163_vm9 = vcmask 523264  }
  0x3b   : > { %s1338_s30 = sshll.u32 %s421_s23, 3  ;;  %1404 = vmatprep.subr.bf16.mxu0 %v1687_v0  ;;  %s1691_s23 = smov 80  }
  0x3c   : > { %s1696_s26 = smov 56   ;;  %s1697_s16 = smov 64  }
  0x3d   : > { %s423_s18 = scalar_lea.vmem %s2070_s0, %s1338_s30  ;;  %s1692_s30 = smov 88  }
  0x3e   : > { %v1869_v3 = vld [vmem:[%s423_s18] sm:$0xff]  ;;  %1405 = vmatpush3.bf16.msra.mxu0 %v1555_v2  ;;  %s1695_s18 = smov 104   ;;  %s1698_s19 = smov 40  }
  0x3f   : > { %v426_v4 = vpack.c.bf16 %v1869_v3, %v1869_v3  ;;  %1416 = vmatprep.subr.bf16.mxu0 %v1687_v0  ;;  %s1699_s20 = smov 48   ;;  %p2071_p9 = scmp.ne.s32.totalorder %s2063_s13, 0 }
  0x41   : > { %1407 = vmatmul.mubr.msk.bf16.vlgmr.msra.gmra.mrb[0].mxu0 %vm443_vm1, %v426_v4 }
  0x42   : > { %1418 = vmatprep.mubr.msk.bf16.mxu0 %vm1688_vm0, %v1687_v0 }
 0x114   : > { %v481_v5 = vpop.f32.mrb[0].mxu0 }
 0x115   : > { %v1878_v6 = vpack.c.bf16 %v481_v5, %v481_v5  ;;  %v1408_v7 = vpop.f32.mrb[1].mxu0 }
 0x116   : > { %v484_v8 = vpop.f32.mrb[2].mxu0 }
 0x117   : > { %600 = vrot.lane.b32.xlu1 %v1878_v6, %s1689_s28  ;;  %489 = vrot.lane.b32.xlu0 %v1878_v6, %s1690_s29  ;;  %v1409_v9 = vpop.f32.mrb[3].mxu0  ;;  %s1700_s28 = smov 8  }
 0x11b   : > { %718 = vrot.lane.b32.xlu1 %v1878_v6, %s1691_s23  ;;  %602 = vrot.lane.b32.xlu0 %v1878_v6, %s1692_s30  ;;  %s417_s30 = sand.u32 1, %s1674_s22  }
 0x11f   : > { %834 = vrot.lane.b32.xlu1 %v1878_v6, %s1693_s15  ;;  %716 = vrot.lane.b32.xlu0 %v1878_v6, %s1694_s17  ;;  %s1701_s17 = smov 16   ;;  %s1337_s15 = sshll.u32 %s417_s30, 3 }
 0x123   : > { %832 = vrot.lane.b32.xlu0 %v1878_v6, %s1695_s18  ;;  %s1702_s18 = smov 24  }
 0x189   : > { %v490_v10 = vpop.permute.xlu0 %489  ;;  %v601_v13 = vpop.permute.xlu1 %600 }
 0x18a   : > { %v496_v11 = vsel %vm491_vm2, %v490_v10, 0 }
 0x18b   : > { %1411 = vmatpush3.bf16.xpose.msra.mxu1 %v496_v11 }
 0x18c   : > { %1422 = vmatprep.subr.bf16.mxu1 %v1687_v0 }
 0x18d   : > { %v603_v12 = vpop.permute.xlu0 %602  ;;  %v719_v15 = vpop.permute.xlu1 %718 }
 0x18e   : > { %v608_v14 = vsel %vm491_vm2, %v603_v12, 0  ;;  %v724_v16 = vsel %vm491_vm2, %v719_v15, 0 }
 0x191   : > { %v835_v17 = vpop.permute.xlu1 %834  ;;  %v717_v18 = vpop.permute.xlu0 %716 }
 0x192   : > { %1413 = vmatmul.mubr.msk.bf16.vlgmr.msra.gmra.mrb[0].mxu1 %vm491_vm2, %v1878_v6  ;;  %v840_v19 = vsel %vm491_vm2, %v835_v17, 0 }
 0x193   : > { %1423 = vmatpush3.bf16.xpose.msra.mxu1 %v608_v14  ;;  %1424 = vmatprep.mubr.msk.bf16.mxu1 %vm1688_vm0, %v1687_v0 }
 0x194   : > { %1434 = vmatprep.subr.bf16.mxu1 %v1687_v0 }
 0x195   : > { %v833_v20 = vpop.permute.xlu0 %832 }
 0x19a   : > { %1425 = vmatmul.mubr.msk.bf16.vlgmr.msra.gmra.mrb[4].mxu1 %vm491_vm2, %v601_v13 }
 0x19b   : > { %1435 = vmatpush3.bf16.xpose.msra.mxu1 %v724_v16  ;;  %1436 = vmatprep.mubr.msk.bf16.mxu1 %vm1688_vm0, %v1687_v0 }
 0x19c   : > { %1446 = vmatprep.subr.bf16.mxu1 %v1687_v0 }
 0x1a2   : > { %1437 = vmatmul.mubr.msk.bf16.vlgmr.msra.gmra.mrb[8].mxu1 %vm491_vm2, %v717_v18 }
 0x1a3   : > { %1447 = vmatpush3.bf16.xpose.msra.mxu1 %v840_v19  ;;  %1448 = vmatprep.mubr.msk.bf16.mxu1 %vm1688_vm0, %v1687_v0 }
 0x1a4   : > { %1458 = vmatprep.subr.bf16.mxu1 %v1687_v0 }
 0x1aa   : > { %1449 = vmatmul.mubr.msk.bf16.vlgmr.msra.gmra.mrb[12].mxu1 %vm491_vm2, %v833_v20 }
 0x1ab   : > { %1462 = vmatprep.mubr.msk.bf16.mxu1 %vm1688_vm0, %v1687_v0 }
 0x265   : > { %v532_v21 = vpop.f32.mrb[0].mxu1 }
 0x266   : > { %v1414_v22 = vpop.f32.mrb[1].mxu1  ;;  %v538_v23 = vsel %vm491_vm2, %v532_v21, -inf }
 0x267   : > { %539 = vmax.xlane.f32.xlu1 %v538_v23  ;;  %v535_v24 = vpop.f32.mrb[2].mxu1 }
 0x268   : > { %v1415_v25 = vpop.f32.mrb[3].mxu1 }
 0x26d   : > { %v644_v26 = vpop.f32.mrb[4].mxu1 }
 0x26e   : > { %v1426_v27 = vpop.f32.mrb[5].mxu1  ;;  %v650_v28 = vsel %vm491_vm2, %v644_v26, -inf }
 0x26f   : > { %651 = vmax.xlane.f32.xlu0 %v650_v28  ;;  %v647_v29 = vpop.f32.mrb[6].mxu1 }
 0x270   : > { %v1427_v30 = vpop.f32.mrb[7].mxu1 }
 0x275   : > { %v760_v31 = vpop.f32.mrb[8].mxu1 }
 0x276   : > { %v1438_v32 = vpop.f32.mrb[9].mxu1  ;;  %v766_v33 = vsel %vm491_vm2, %v760_v31, -inf }
 0x277   : > { %767 = vmax.xlane.f32.xlu0 %v766_v33  ;;  %v763_v34 = vpop.f32.mrb[10].mxu1  ;;  %v1557_v32 = vld [vmem:[%s2045_s2 + $0x8] sm:$0xff]  }
 0x278   : > { %v1439_v35 = vpop.f32.mrb[11].mxu1 }
 0x27d   : > { %v876_v36 = vpop.f32.mrb[12].mxu1 }
 0x27e   : > { %v1450_v37 = vpop.f32.mrb[13].mxu1  ;;  %v882_v38 = vsel %vm491_vm2, %v876_v36, -inf }
 0x27f   : > { %883 = vmax.xlane.f32.xlu1 %v882_v38  ;;  %v879_v39 = vpop.f32.mrb[14].mxu1 }
 0x280   : > { %v1451_v40 = vpop.f32.mrb[15].mxu1 }
 0x2f4   : > { %v540_v41 = vpop.xlane.xlu1 %539 }
 0x2f5   : > { %v541_v42 = vsub.f32 %v532_v21, %v540_v41 }
 0x2f7   : > { %v542_v43 = vmul.f32 1.442695, %v541_v42 }
 0x2f9   : > { %1564 = vpow2.f32 %v542_v43 }
 0x2fc   : > { %v652_v44 = vpop.xlane.xlu0 %651 }
 0x2fd   : > { %v653_v45 = vsub.f32 %v644_v26, %v652_v44 }
 0x2ff   : > { %v654_v46 = vmul.f32 1.442695, %v653_v45 }
 0x301   : > { %1566 = vpow2.f32 %v654_v46  ;;  %v1350_v46 = vld [vmem:[%s2046_s3] ss:$0 sm:$0xff] }
 0x303   : > { %v1565_v47 = vpop.eup %1564 }
 0x304   : > { %v768_v48 = vpop.xlane.xlu0 %767  ;;  %v544_v49 = vsel %vm491_vm2, %v1565_v47, 0.0 }
 0x305   : > { %v769_v50 = vsub.f32 %v760_v31, %v768_v48  ;;  %545 = vadd.xlane.f32.xlu0 %v544_v49  ;;  %v1556_v31 = vld [vmem:[%s2045_s2] sm:$0xff]  }
 0x306   : > { %1459 = vmatpush3.bf16.msra.mxu1 %v1556_v31 }
 0x307   : > { %v770_v51 = vmul.f32 1.442695, %v769_v50  ;;  %1460 = vmatprep.subr.bf16.mxu1 %v1687_v0 }
 0x309   : > { %1568 = vpow2.f32 %v770_v51 }
 0x30a   : > { %1461 = vmatpush3.bf16.msra.mxu1 %v1557_v32 }
 0x30b   : > { %v1567_v52 = vpop.eup %1566  ;;  %1474 = vmatprep.subr.bf16.mxu1 %v1687_v0 }
 0x30c   : > { %v656_v53 = vsel %vm491_vm2, %v1567_v52, 0.0  ;;  %v884_v56 = vpop.xlane.xlu1 %883 }
 0x30d   : > { %657 = vadd.xlane.f32.xlu1 %v656_v53  ;;  %v885_v57 = vsub.f32 %v876_v36, %v884_v56 }
 0x30f   : > { %v886_v58 = vmul.f32 1.442695, %v885_v57 }
 0x311   : > { %1570 = vpow2.f32 %v886_v58 }
 0x313   : > { %v1569_v54 = vpop.eup %1568 }
 0x314   : > { %v772_v55 = vsel %vm491_vm2, %v1569_v54, 0.0 }
 0x315   : > { %773 = vadd.xlane.f32.xlu0 %v772_v55 }
 0x31b   : > { %v1571_v59 = vpop.eup %1570 }
 0x31c   : > { %v888_v60 = vsel %vm491_vm2, %v1571_v59, 0.0 }
 0x31e   : > { %662 = vrot.lane.b32.xlu1 %v1878_v6, %s1696_s26 }
 0x32b   : > { %550 = vrot.lane.b32.xlu0 %v1878_v6, %s1697_s16 }
 0x32f   : > { %894 = vrot.lane.b32.xlu0 %v1878_v6, %s1698_s19  ;;  %s1369_s19 = sshll.u32 %s1790_s25, 7  ;;  %s1703_s25 = smov [#allocation6]  }
 0x330   : > { %s2000_s0 = scalar_lea.hbm %s2055_s12, %s1369_s19 }
 0x342   : > { %889 = vadd.xlane.f32.xlu1 %v888_v60  ;;  %v1559_v60 = vld [vmem:[#allocation3 + $0x8] sm:$0xff]  }
 0x353   : > { %778 = vrot.lane.b32.xlu1 %v1878_v6, %s1699_s20  ;;  %s419_s20 = scalar_lea.vmem [#allocation6], %s1337_s15  ;;  %s1620_s15 = sshll.u32 %s1703_s25, 4  ;;  %s1621_s15 = int_to_ptr.vmem [resolvable:$false] %s1620_s15 }
 0x354   : > { %s1622_s26 = scalar_lea.vmem %s1621_s15, 256 }
 0x392   : > { %v546_v61 = vpop.xlane.xlu0 %545 }
 0x393   : > { %1572 = vrcp.f32 %v546_v61  ;;  %v1561_v61 = vld [vmem:[%s2051_s8 + $0x8] sm:$0xff]  }
 0x39a   : > { %v658_v62 = vpop.xlane.xlu1 %657 }
 0x39b   : > { %1574 = vrcp.f32 %v658_v62 }
 0x39d   : > { %v1573_v63 = vpop.eup %1572 }
 0x39e   : > { %v548_v2 = vmul.f32 %v1573_v63, %v1565_v47  ;;  %v663_v7 = vpop.permute.xlu1 %662 }
 0x39f   : > { %v668_v10 = vsel %vm555_vm3, %v663_v7, 0 }
 0x3a0   : > { %v549_v8 = vpack.c.bf16 %v548_v2, %v548_v2 }
 0x3a2   : > { %v774_v1 = vpop.xlane.xlu0 %773 }
 0x3a3   : > { %1576 = vrcp.f32 %v774_v1 }
 0x3a5   : > { %v1575_v9 = vpop.eup %1574 }
 0x3a6   : > { %v551_v4 = vpop.permute.xlu0 %550  ;;  %v660_v6 = vmul.f32 %v1575_v9, %v1567_v52  ;;  %v1354_v9 = vld [vmem:[%s2047_s4] ss:$0 sm:$0xff] }
 0x3a7   : > { %v557_v5 = vsel %vm555_vm3, %v551_v4, 0 }
 0x3a8   : > { %1417 = vmatpush3.bf16.msra.mxu0 %v557_v5  ;;  %v661_v11 = vpack.c.bf16 %v660_v6, %v660_v6 }
 0x3a9   : > { %1428 = vmatprep.subr.bf16.mxu0 %v1687_v0 }
 0x3aa   : > { %v895_v17 = vpop.permute.xlu0 %894 }
 0x3ab   : > { %1419 = vmatmul.mubr.msk.bf16.vlgmr.msra.gmra.mrb[4].mxu0 %vm491_vm2, %v549_v8  ;;  %v900_v19 = vsel %vm555_vm3, %v895_v17, 0  ;;  %v1356_v17 = vld [vmem:[%s2050_s7] ss:$0 sm:$0xff] }
 0x3ac   : > { %1429 = vmatpush3.bf16.msra.mxu0 %v668_v10  ;;  %1430 = vmatprep.mubr.msk.bf16.mxu0 %vm1688_vm0, %v1687_v0 }
 0x3ad   : > { %1440 = vmatprep.subr.bf16.mxu0 %v1687_v0  ;;  %v1577_v12 = vpop.eup %1576 }
 0x3ae   : > { %v776_v14 = vmul.f32 %v1577_v12, %v1569_v54 }
 0x3b0   : > { %v777_v18 = vpack.c.bf16 %v776_v14, %v776_v14 }
 0x3b3   : > { %1431 = vmatmul.mubr.msk.bf16.vlgmr.msra.gmra.mrb[8].mxu0 %vm491_vm2, %v661_v11  ;;  %v1355_v11 = vld [vmem:[%s2048_s5] ss:$0 sm:$0xff] }
 0x3b4   : > { %1442 = vmatprep.mubr.msk.bf16.mxu0 %vm1688_vm0, %v1687_v0 }
 0x3cf   : > { %v890_v13 = vpop.xlane.xlu1 %889 }
 0x3d0   : > { %1578 = vrcp.f32 %v890_v13 }
 0x3d3   : > { %v779_v15 = vpop.permute.xlu1 %778 }
 0x3d4   : > { %v784_v16 = vsel %vm555_vm3, %v779_v15, 0  ;;  %v1562_v15 = vld [vmem:[%s2051_s8 + $0x10] sm:$0xff]  }
 0x3d5   : > { %1441 = vmatpush3.bf16.msra.mxu0 %v784_v16  ;;  %v1563_v16 = vld [vmem:[%s2051_s8 + $0x18] sm:$0xff]  }
 0x3d6   : > { %1452 = vmatprep.subr.bf16.mxu0 %v1687_v0 }
 0x3d8   : > { %1443 = vmatmul.mubr.msk.bf16.vlgmr.msra.gmra.mrb[12].mxu0 %vm491_vm2, %v777_v18 }
 0x3d9   : > { %1453 = vmatpush3.bf16.msra.mxu0 %v900_v19  ;;  %1454 = vmatprep.mubr.msk.bf16.mxu0 %vm1688_vm0, %v1687_v0 }
 0x3da   : > { %v1579_v20 = vpop.eup %1578  ;;  %1466 = vmatprep.subr.bf16.mxu0 %v1687_v0 }
 0x3db   : > { %v892_v21 = vmul.f32 %v1579_v20, %v1571_v59  ;;  %v1558_v59 = vld [vmem:[#allocation3] sm:$0xff]  }
 0x3dd   : > { %v893_v22 = vpack.c.bf16 %v892_v21, %v892_v21 }
 0x3e0   : > { %1455 = vmatmul.mubr.msk.bf16.vlgmr.msra.gmra.mrb[16].mxu0 %vm491_vm2, %v893_v22 }
 0x3e1   : > { %1470 = vmatprep.mubr.msk.bf16.mxu0 %vm1688_vm0, %v1687_v0  ;;  %1467 = vmatpush3.bf16.msra.mxu0 %v1558_v59 }
 0x3e2   : > { %1468 = vmatprep.subr.bf16.mxu0 %v1687_v0 }
 0x3e5   : > { %1469 = vmatpush3.bf16.msra.mxu0 %v1559_v60 }
 0x47e   : > { %v593_v23 = vpop.f32.mrb[4].mxu0 }
 0x47f   : > { %599 = vst.msk [vmem:[#allocation2] sm:$0xff] %vm491_vm2, %v593_v23  ;;  %v1420_v24 = vpop.f32.mrb[5].mxu0 }
 0x480   : > { %v596_v25 = vpop.f32.mrb[6].mxu0 }
 0x481   : > { %v1421_v26 = vpop.f32.mrb[7].mxu0 }
 0x486   : > { %v704_v27 = vpop.f32.mrb[8].mxu0 }
 0x487   : > { %711 = vrot.lane.b32.xlu1 %v704_v27, %s1700_s28  ;;  %v1432_v28 = vpop.f32.mrb[9].mxu0  ;;  %s1260_s28 = sshll.u32 %s419_s20, 4  ;;  %s2002_s28 = int_to_ptr.vmem [resolvable:$true] %s1260_s28 }
 0x488   : > { %v707_v29 = vpop.f32.mrb[10].mxu0  ;;  %p1623_p2 = scmp.lt.s32.totalorder %s2002_s28, %s1621_s15 }
 0x489   : > { %v1433_v30 = vpop.f32.mrb[11].mxu0 }
 0x4ab   : > { %v820_v33 = vpop.f32.mrb[12].mxu0 }
 0x4ac   : > { %827 = vrot.lane.b32.xlu0 %v820_v33, %s1701_s17  ;;  %v1444_v34 = vpop.f32.mrb[13].mxu0  ;;  %s1247_s17 = scalar_lea.sflag [#allocation5], %s417_s30 }
 0x4ad   : > { %v823_v35 = vpop.f32.mrb[14].mxu0 }
 0x4ae   : > { %v1445_v36 = vpop.f32.mrb[15].mxu0 }
 0x4b3   : > { %v936_v37 = vpop.f32.mrb[16].mxu0 }
 0x4b4   : > { %943 = vrot.lane.b32.xlu1 %v936_v37, %s1702_s18  ;;  %v1456_v38 = vpop.f32.mrb[17].mxu0  ;;  %s1616_s18 = scalar_lea.vmem %s2002_s28, 128 }
 0x4b5   : > { %v939_v39 = vpop.f32.mrb[18].mxu0  ;;  %p1617_p6 = scmp.ne.s32.totalorder %s2002_s28, %s1616_s18  ;;  %p1624_p3 = scmp.lt.s32.totalorder %s1622_s26, %s1616_s18 }
 0x4b6   : > { %v1457_v40 = vpop.f32.mrb[19].mxu0 }
 0x4b7   : > { %p1618_p10 = pnand %p1617_p6, %p2071_p9  ;;  %p1625_p4 = por %p1624_p3, %p1623_p2 }
 0x4b9   : > { %p1619_p12 = pneg %p1618_p10 }
 0x4bb   : > { %p1626_p7 = pnand %p1625_p4, %p1619_p12 }
 0x4f9   : > { %v712_v41 = vpop.permute.xlu1 %711 }
 0x4fa   : > { %715 = vst.msk [vmem:[#allocation2] sm:$0xff] %vm714_vm4, %v712_v41 }
 0x51e   : > { %v828_v42 = vpop.permute.xlu0 %827 }
 0x51f   : > { %831 = vst.msk [vmem:[#allocation2] sm:$0xff] %vm830_vm5, %v828_v42 }
 0x526   : > { %v944_v43 = vpop.permute.xlu1 %943 }
 0x527   : > { %947 = vst.msk [vmem:[#allocation2] sm:$0xff] %vm946_vm6, %v944_v43 }
 0x52e   : > { %v948_v44 = vld [vmem:[#allocation2] sm:$0xff] }
 0x52f   : > { %v949_v45 = vpack.c.bf16 %v948_v44, %v948_v44 }
 0x531   : > { %1463 = vmatmul.mubr.msk.bf16.vlgmr.msra.gmra.mrb[16].mxu1 %vm443_vm1, %v949_v45  ;;  %v1366_v45 = vld [vmem:[%s2053_s10] ss:$0 sm:$0xff] }
 0x532   : > { %1482 = vmatprep.mubr.msk.bf16.mxu1 %vm1688_vm0, %v1687_v0 }
 0x604   : > { %v1010_v47 = vpop.f32.mrb[16].mxu1 }
 0x605   : > { %v1011_v48 = vadd.f32 %v1350_v46, %v1010_v47  ;;  %v1464_v49 = vpop.f32.mrb[17].mxu1 }
 0x606   : > { %v1013_v50 = vpop.f32.mrb[18].mxu1 }
 0x607   : > { %v1465_v51 = vpop.f32.mrb[19].mxu1  ;;  %v1016_v52 = vadd.f32 %v1011_v48, %v1869_v3  ;;  %v1560_v3 = vld [vmem:[%s2051_s8] sm:$0xff]  }
 0x608   : > { %1475 = vmatpush3.bf16.msra.mxu1 %v1560_v3  ;;  %v1367_v48 = vld [vmem:[%s2054_s11] ss:$0 sm:$0xff] }
 0x609   : > { %v1017_v53 = vsel %vm443_vm1, %v1016_v52, 0.0  ;;  %1476 = vmatprep.subr.bf16.mxu1 %v1687_v0 }
 0x60a   : > { %1018 = vadd.xlane.f32.xlu0 %v1017_v53 }
 0x60c   : > { %1477 = vmatpush3.bf16.msra.mxu1 %v1561_v61 }
 0x60d   : > { %1478 = vmatprep.subr.bf16.mxu1 %v1687_v0 }
 0x610   : > { %1479 = vmatpush3.bf16.msra.mxu1 %v1562_v15 }
 0x611   : > { %1480 = vmatprep.subr.bf16.mxu1 %v1687_v0  ;;  %v1360_v0 = vld [vmem:[%s2052_s9] ss:$0 sm:$0xff] }
 0x614   : > { %1481 = vmatpush3.bf16.msra.mxu1 %v1563_v16 }
 0x697   : > { %v1019_v54 = vpop.xlane.xlu0 %1018 }
 0x698   : > { %v1021_v55 = vmul.f32 0.03125, %v1019_v54 }
 0x69a   : > { %v1022_v56 = vsub.f32 %v1016_v52, %v1021_v55 }
 0x69c   : > { %v1023_v57 = vmul.f32 %v1022_v56, %v1022_v56  ;;  %v1042_v10 = vmul.f32 %v1354_v9, %v1022_v56 }
 0x69e   : > { %v1024_v58 = vsel %vm443_vm1, %v1023_v57, 0.0 }
 0x69f   : > { %1025 = vadd.xlane.f32.xlu1 %v1024_v58 }
 0x72c   : > { %v1026_v62 = vpop.xlane.xlu1 %1025 }
 0x72d   : > { %v1027_v63 = vmul.f32 0.032258064, %v1026_v62 }
 0x72f   : > { %1580 = vrsqrt.f32 %v1027_v63  ;;  %vm1030_vm7 = vcmp.eq.f32.partialorder %v1027_v63, inf  ;;  %v1033_v4 = vand.u32 2147483648, %v1027_v63  ;;  %vm1032_vm8 = vcmp.eq.f32.partialorder %v1027_v63, 0.0 }
 0x739   : > { %v1581_v1 = vpop.eup %1580 }
 0x73a   : > { %v1029_v2 = vmul.f32 %v1581_v1, %v1027_v63 }
 0x73c   : > { %v1031_v5 = vsel %vm1030_vm7, %v1027_v63, %v1029_v2 }
 0x73d   : > { %v1034_v7 = vsel %vm1032_vm8, %v1033_v4, %v1031_v5 }
 0x73e   : > { %v1043_v8 = vadd.f32 1e-06, %v1034_v7 }
 0x740   : > { %1582 = vrcp.f32 %v1043_v8 }
 0x74a   : > { %v1583_v6 = vpop.eup %1582 }
 0x74b   : > { %v1046_v12 = vmul.f32 %v1583_v6, %v1042_v10 }
 0x74d   : > { %v1054_v13 = vadd.f32 %v1355_v11, %v1046_v12 }
 0x74f   : > { %v1055_v14 = vpack.c.bf16 %v1054_v13, %v1054_v13 }
 0x751   : > { %1471 = vmatmul.mubr.msk.bf16.vlgmr.msra.gmra.mrb[20].mxu0 %vm443_vm1, %v1055_v14 }
 0x824   : > { %v1116_v18 = vpop.f32.mrb[20].mxu0 }
 0x825   : > { %v1117_v19 = vadd.f32 %v1356_v17, %v1116_v18  ;;  %v1472_v20 = vpop.f32.mrb[21].mxu0 }
 0x826   : > { %v1119_v21 = vpop.f32.mrb[22].mxu0 }
 0x827   : > { %v1122_v22 = vmax.f32 %v1117_v19, 0.0  ;;  %v1473_v23 = vpop.f32.mrb[23].mxu0 }
 0x829   : > { %v1123_v24 = vpack.c.bf16 %v1122_v22, %v1122_v22 }
 0x82b   : > { %1483 = vmatmul.mubr.msk.bf16.vlgmr.msra.gmra.mrb[20].mxu1 %vm1163_vm9, %v1123_v24 }
 0x8fe   : > { %v1201_v25 = vpop.f32.mrb[20].mxu1 }
 0x8ff   : > { %v1202_v26 = vadd.f32 %v1360_v0, %v1201_v25  ;;  %v1484_v27 = vpop.f32.mrb[21].mxu1 }
 0x900   : > { %v1204_v28 = vpop.f32.mrb[22].mxu1 }
 0x901   : > { %v1485_v29 = vpop.f32.mrb[23].mxu1  ;;  %v1207_v30 = vadd.f32 %v1202_v26, %v1054_v13 }
 0x903   : > { %v1208_v31 = vsel %vm443_vm1, %v1207_v30, 0.0 }
 0x904   : > { %1209 = vadd.xlane.f32.xlu0 %v1208_v31 }
 0x991   : > { %v1210_v32 = vpop.xlane.xlu0 %1209 }
 0x992   : > { %v1211_v33 = vmul.f32 0.03125, %v1210_v32 }
 0x994   : > { %v1212_v34 = vsub.f32 %v1207_v30, %v1211_v33 }
 0x996   : > { %v1213_v35 = vmul.f32 %v1212_v34, %v1212_v34  ;;  %v1232_v46 = vmul.f32 %v1366_v45, %v1212_v34 }
 0x998   : > { %v1214_v36 = vsel %vm443_vm1, %v1213_v35, 0.0 }
 0x999   : > { %1215 = vadd.xlane.f32.xlu0 %v1214_v36 }
 0xa26   : > { %v1216_v37 = vpop.xlane.xlu0 %1215 }
 0xa27   : > { %v1217_v38 = vmul.f32 0.032258064, %v1216_v37 }
 0xa29   : > { %1584 = vrsqrt.f32 %v1217_v38  ;;  %vm1220_vm10 = vcmp.eq.f32.partialorder %v1217_v38, inf  ;;  %v1223_v41 = vand.u32 2147483648, %v1217_v38  ;;  %vm1222_vm11 = vcmp.eq.f32.partialorder %v1217_v38, 0.0 }
 0xa33   : > { %v1585_v39 = vpop.eup %1584 }
 0xa34   : > { %v1219_v40 = vmul.f32 %v1585_v39, %v1217_v38 }
 0xa36   : > { %v1221_v42 = vsel %vm1220_vm10, %v1217_v38, %v1219_v40 }
 0xa37   : > { %v1224_v43 = vsel %vm1222_vm11, %v1223_v41, %v1221_v42 }
 0xa38   : > { %v1233_v44 = vadd.f32 1e-06, %v1224_v43 }
 0xa3a   : > { %1586 = vrcp.f32 %v1233_v44 }
 0xa44   : > { %v1587_v47 = vpop.eup %1586 }
 0xa45   : > { %v1236_v49 = vmul.f32 %v1587_v47, %v1232_v46 }
 0xa47   : > { %v1244_v50 = vadd.f32 %v1367_v48, %v1236_v49 }
 0xa49   : > { %1245 = vst.msk [vmem:[%s419_s20] sm:$0xff] %vm443_vm1, %v1244_v50 }
 0xa4a   : > { %1629 = shalt.err (!%p1626_p7)
}
 0xa4b   : > { %s1630_s30 = scalar_lea.hbm %s2000_s0, 128  ;;  %s1634_s20 = scalar_lea.hbm %s2055_s12, 256 }
 0xa4c   : > { %p1631_p8 = scmp.ne.s32.totalorder %s2000_s0, %s1630_s30  ;;  %p1635_p1 = scmp.lt.u32.totalorder %s2000_s0, %s2055_s12 }
 0xa4d   : > { %p1636_p0 = scmp.lt.u32.totalorder %s1634_s20, %s1630_s30  ;;  %p1638_p6 = scmp.lt.u32.totalorder %s1630_s30, %s2000_s0 }
 0xa4e   : > { %p1632_p11 = pnand %p1631_p8, %p2071_p9 }
 0xa4f   : > { %p1637_p5 = por %p1636_p0, %p1635_p1 }
 0xa50   : > { %p1633_p13 = pneg %p1632_p11 }
 0xa51   : > { %p1639_p10 = por %p1638_p6, %p1637_p5 }
 0xa53   : > { %p1640_p12 = pnand %p1639_p10, %p1633_p13 }
 0xa55   : > { %1643 = shalt.err (!%p1640_p12)
}
 0xa56   : > { %1490 = dma.vmem_to_hbm [thread:$0]  (%p2071_p9), %s2002_s28, 128, %s2000_s0, %s1247_s17  }
 0xa57 PF: > { %p1502_p2 = scmp.ge.s32.totalorder %s1682_s24, 2  ;;  %s1272_s18 = sand.u32 1, %s1670_s21  }
 0xa58   : > { %p2072_p3 = scmp.ne.s32.totalorder %s2064_s14, 0  ;;  %s1273_s25 = scalar_lea.sflag [#allocation5], %s1272_s18 }
 0xa5a   : > { %p1497_p4 = pnand %p1502_p2, %p2072_p3 }
 0xa5c   : > { %1665 = dma.done.wait (!%p1497_p4), %s1273_s25, 128  }
 0xa5d   : > { %1667 = vsyncadd (!%p1497_p4), %s1273_s25, 4294967168  ;;  %s2073_s15 = sld [smem:[#allocation9_spill]]  ;;  %s2074_s23 = sld [smem:[#allocation10_spill]] }
 0xa5e   : > { %p23_p7 = scmp.ge.s32.totalorder %s1794_s27, 4   ;;  %s2075_s21 = smov %s1674_s22 }
 0xa5f   : > { %s2077_s24 = smov %s1794_s27 }
 0xa60   :  { %25 = sbr.rel (!%p23_p7) target bundleno = 6 (0x6), region = 108 }
 0xa63   : > { %s2076_s22 = smov %s2073_s15 }
 0xa67   :  { %1278 = vsyncpa [#allocation4], 1 }
 0xa68   :  { %1280 = vsyncpa [#allocation4 + $0x1], 1 }
 0xa69   :  { %1281 = vsyncpa [#allocation5], 1 }
 0xa6a   :  { %1283 = vsyncpa [#allocation5 + $0x1], 1 }

// kernel: tpu_custom_call.1
= control target key start
LH: loop header
LB: loop body
LE: loop exit
PB: predicated region body
PF: predicated region fallthrough
CT: control target
= control target key end

     0   :  { %s2043_s0 = inlined_call_operand.vmem [shape: f32[16,32], index: 0, kind: input, shape index: {}]   ;;  %s2044_s1 = inlined_call_operand.vmem [shape: bf16[32,96], index: 1, kind: input, shape index: {}]   ;;  %s2045_s2 = inlined_call_operand.vmem [shape: bf16[32,32], index: 2, kind: input, shape index: {}]   ;;  %s2046_s3 = inlined_call_operand.vmem [shape: f32[1,32], index: 3, kind: input, shape index: {}]   ;;  %s2047_s4 = inlined_call_operand.vmem [shape: f32[1,32], index: 4, kind: input, shape index: {}]   ;;  %s2048_s5 = inlined_call_operand.vmem [shape: f32[1,32], index: 5, kind: input, shape index: {}]   ;;  %s2049_s6 = inlined_call_operand.hbm [shape: bf16[32,64], index: 6, kind: input, shape index: {}]   ;;  %s2050_s7 = inlined_call_operand.vmem [shape: f32[1,64], index: 7, kind: input, shape index: {}]   ;;  %s2051_s8 = inlined_call_operand.vmem [shape: bf16[64,32], index: 8, kind: input, shape index: {}]   ;;  %s2052_s9 = inlined_call_operand.vmem [shape: f32[1,32], index: 9, kind: input, shape index: {}]   ;;  %s2053_s10 = inlined_call_operand.vmem [shape: f32[1,32], index: 10, kind: input, shape index: {}]   ;;  %s2054_s11 = inlined_call_operand.vmem [shape: f32[1,32], index: 11, kind: input, shape index: {}]   ;;  %s2055_s12 = inlined_call_operand.hbm [shape: f32[16,32], index: 12, kind: output, shape index: {}]  }
   0x1   :  { %2060 = sst [smem:[#allocation11_spill]] %s2043_s0 }
   0x2   :  { %17 = vsyncpa [#allocation4], 0 }
   0x3   :  { %18 = vsyncpa [#allocation5], 0 }
   0x4   :  { %20 = vsyncpa [#allocation5 + $0x1], 0  ;;  %s1769_s21 = smov 0   ;;  %s1771_s22 = smov 0  }
   0x5   :  { %s1773_s23 = smov 0   ;;  %s1775_s24 = smov 0  }
   0x6 LB: > { %2061 = sst [smem:[#allocation9_spill]] %s1678_s23  ;;  %s1790_s25 = sadd.s32 4294967295, %s1682_s24   ;;  %s1682_s24 = sphi %s1775_s24, %s2077_s24   ;;  %s1678_s23 = sphi %s1773_s23, %s2074_s23   ;;  %s1674_s22 = sphi %s1771_s22, %s2076_s22   ;;  %s1670_s21 = sphi %s1769_s21, %s2075_s21  }
   0x7   : > { %s1331_s26 = sadd.s32 4294967294, %s1682_s24   ;;  %s1794_s27 = sadd.s32 1, %s1682_s24  }
   0x8   : > { %s290_s28 = sadd.s32 1, %s1678_s23  ;;  %s287_s29 = ssub.s32 %s1682_s24, %s1794_s27 }
   0x9   : > { %p300_p0 = scmp.ne.s32.totalorder %s1678_s23, %s1674_s22  ;;  %p288_p1 = scmp.eq.s32.totalorder %s287_s29, 0 }
   0xa   : > { %p301_p2 = scmp.eq.s32.totalorder %s1790_s25, 1  ;;  %p306_p3 = scmp.ne.s32.totalorder %s1674_s22, %s1670_s21 }
   0xb   : > { %p307_p4 = scmp.eq.s32.totalorder %s1331_s26, 1  ;;  %p1332_p7 = scmp.ge.s32.totalorder %s1682_s24, 1 }
   0xc   : > { %s1805_s30 = scalar_select %p288_p1, %s1678_s23, %s290_s28  }
   0xd   : > { %p1807_p5 = por %p301_p2, %p300_p0  ;;  %p1811_p6 = por %p307_p4, %p306_p3 }
   0xe   : > { %2062 = sst [smem:[#allocation10_spill]] %s1805_s30  ;;  %p314_p8 = scmp.lt.s32.totalorder %s1682_s24, 3 }
   0xf   : > { %s2063_s13 = scalar_select %p1807_p5, 1, 0 }
  0x10   : > { %s2064_s14 = scalar_select %p1811_p6, 1, 0 }
  0x11   : > { %p2057_p9 = scmp.eq.s32.totalorder %s1790_s25, 0  ;;  %p1818_p10 = pnand %p1332_p7, %p314_p8 }
  0x12   : > { %s1684_s16 = smov [#allocation3]   ;;  %s1588_s26 = scalar_lea.hbm %s2049_s6, 256 }
  0x13   : > { %s2065_s15 = scalar_select %p1818_p10, 1, 0 }
  0x14   : > { %s341_s17 = sshll.u32 %s1684_s16, 4  ;;  %p1492_p11 = pneg %p1818_p10  ;;  %s342_s17 = int_to_ptr.vmem [resolvable:$true] %s341_s17 }
  0x15   : > { %p1589_p13 = scmp.ne.s32.totalorder %s2049_s6, %s1588_s26  ;;  %p1595_p3 = scmp.lt.u32.totalorder %s1588_s26, %s2049_s6 }
  0x16   : > { %p1826_p12 = pnand %p2057_p9, %p1492_p11 }
  0x18   : > { %p1590_p0 = pneg %p1826_p12 }
  0x1a   : > { %p1591_p1 = pnand %p1590_p0, %p1589_p13 }
  0x1c   : > { %p1592_p2 = pneg %p1591_p1 }
  0x1e   : > { %p1597_p4 = pnand %p1595_p3, %p1592_p2 }
  0x20   : > { %1600 = shalt.err (!%p1597_p4)
}
  0x21   : > { %s1601_s23 = scalar_lea.vmem %s342_s17, 256  ;;  %p1609_p9 = scmp.lt.s32.totalorder %s342_s17, %s342_s17 }
  0x22   : > { %p1602_p7 = scmp.ne.s32.totalorder %s342_s17, %s1601_s23  ;;  %p1610_p6 = scmp.lt.s32.totalorder %s1601_s23, %s1601_s23 }
  0x24   : > { %p1604_p8 = pnand %p1602_p7, %p1590_p0  ;;  %p1611_p5 = por %p1610_p6, %p1609_p9 }
  0x26   : > { %p1605_p11 = pneg %p1604_p8 }
  0x28   : > { %p1612_p10 = pnand %p1611_p5, %p1605_p11 }
  0x2a   : > { %1615 = shalt.err (!%p1612_p10)
}
  0x2b   : > { %s1685_s19 = smov 64   ;;  %s1686_s20 = smov 4  }
  0x2c   : > { %1495 = dma.hbm_to_vmem [thread:$0]  (!%p1826_p12), %s2049_s6, 256, %s342_s17, [#allocation4], %s1685_s19, %s1685_s19, %s1686_s20  }
  0x2d   : > { %p2067_p13 = scmp.ne.s32.totalorder %s2065_s15, 0 }
  0x2e   : > { %p2068_p1 = scmp.eq.s32.totalorder (!%p2067_p13), %s1790_s25, 0 }
  0x2f   : > { %379 = sbr.rel (%p2067_p13) target bundleno = 2647 (0xa57), region = 68 }
  0x36   : > { %1661 = dma.done.wait (%p2068_p1), [#allocation4], 256   ;;  %p2069_p0 = pmov %p2068_p1 }
  0x37   : > { %p420_p5 = scmp.lt.s32.totalorder %s1790_s25, 1  ;;  %v1687_v0 = vmov 0.0   ;;  %vm1688_vm0 = vmmov 0   ;;  %s2070_s0 = sld [smem:[#allocation11_spill]]  ;;  %v1554_v1 = vld [vmem:[%s2044_s1] sm:$0xff]   ;;  %v1555_v2 = vld [vmem:[%s2044_s1 + $0x8] sm:$0xff]  }
  0x38   : > { %1663 = vsyncadd (%p2069_p0), [#allocation4], 4294967040  ;;  %1402 = vmatprep.subr.bf16.mxu0 %v1687_v0  ;;  %1406 = vmatprep.mubr.msk.bf16.mxu0 %vm1688_vm0, %v1687_v0  ;;  %vm443_vm1 = vcmask 261120   ;;  %s1689_s28 = smov 120   ;;  %s1690_s29 = smov 96   ;;  %vm491_vm2 = vcmask 64512  }
  0x39   : > { %s421_s23 = scalar_select %p420_p5, %s1790_s25, 1  ;;  %1410 = vmatprep.subr.bf16.mxu1 %v1687_v0  ;;  %1412 = vmatprep.mubr.msk.bf16.mxu1 %vm1688_vm0, %v1687_v0  ;;  %vm555_vm3 = vcmask 1043456   ;;  %vm714_vm4 = vcmask 130112   ;;  %vm830_vm5 = vcmask 195712   ;;  %vm946_vm6 = vcmask 261312  }
  0x3a   : > { %1403 = vmatpush3.bf16.msra.mxu0 %v1554_v1  ;;  %s1693_s15 = smov 72   ;;  %s1694_s17 = smov 112   ;;  %vm1163_vm9 = vcmask 523264  }
  0x3b   : > { %s1338_s30 = sshll.u32 %s421_s23, 3  ;;  %1404 = vmatprep.subr.bf16.mxu0 %v1687_v0  ;;  %s1691_s23 = smov 80  }
  0x3c   : > { %s1696_s26 = smov 56   ;;  %s1697_s16 = smov 64  }
  0x3d   : > { %s423_s18 = scalar_lea.vmem %s2070_s0, %s1338_s30  ;;  %s1692_s30 = smov 88  }
  0x3e   : > { %v1869_v3 = vld [vmem:[%s423_s18] sm:$0xff]  ;;  %1405 = vmatpush3.bf16.msra.mxu0 %v1555_v2  ;;  %s1695_s18 = smov 104   ;;  %s1698_s19 = smov 40  }
  0x3f   : > { %v426_v4 = vpack.c.bf16 %v1869_v3, %v1869_v3  ;;  %1416 = vmatprep.subr.bf16.mxu0 %v1687_v0  ;;  %s1699_s20 = smov 48   ;;  %p2071_p9 = scmp.ne.s32.totalorder %s2063_s13, 0 }
  0x41   : > { %1407 = vmatmul.mubr.msk.bf16.vlgmr.msra.gmra.mrb[0].mxu0 %vm443_vm1, %v426_v4 }
  0x42   : > { %1418 = vmatprep.mubr.msk.bf16.mxu0 %vm1688_vm0, %v1687_v0 }
 0x114   : > { %v481_v5 = vpop.f32.mrb[0].mxu0 }
 0x115   : > { %v1878_v6 = vpack.c.bf16 %v481_v5, %v481_v5  ;;  %v1408_v7 = vpop.f32.mrb[1].mxu0 }
 0x116   : > { %v484_v8 = vpop.f32.mrb[2].mxu0 }
 0x117   : > { %600 = vrot.lane.b32.xlu1 %v1878_v6, %s1689_s28  ;;  %489 = vrot.lane.b32.xlu0 %v1878_v6, %s1690_s29  ;;  %v1409_v9 = vpop.f32.mrb[3].mxu0  ;;  %s1700_s28 = smov 8  }
 0x11b   : > { %718 = vrot.lane.b32.xlu1 %v1878_v6, %s1691_s23  ;;  %602 = vrot.lane.b32.xlu0 %v1878_v6, %s1692_s30  ;;  %s417_s30 = sand.u32 1, %s1674_s22  }
 0x11f   : > { %834 = vrot.lane.b32.xlu1 %v1878_v6, %s1693_s15  ;;  %716 = vrot.lane.b32.xlu0 %v1878_v6, %s1694_s17  ;;  %s1701_s17 = smov 16   ;;  %s1337_s15 = sshll.u32 %s417_s30, 3 }
 0x123   : > { %832 = vrot.lane.b32.xlu0 %v1878_v6, %s1695_s18  ;;  %s1702_s18 = smov 24  }
 0x189   : > { %v490_v10 = vpop.permute.xlu0 %489  ;;  %v601_v13 = vpop.permute.xlu1 %600 }
 0x18a   : > { %v496_v11 = vsel %vm491_vm2, %v490_v10, 0 }
 0x18b   : > { %1411 = vmatpush3.bf16.xpose.msra.mxu1 %v496_v11 }
 0x18c   : > { %1422 = vmatprep.subr.bf16.mxu1 %v1687_v0 }
 0x18d   : > { %v603_v12 = vpop.permute.xlu0 %602  ;;  %v719_v15 = vpop.permute.xlu1 %718 }
 0x18e   : > { %v608_v14 = vsel %vm491_vm2, %v603_v12, 0  ;;  %v724_v16 = vsel %vm491_vm2, %v719_v15, 0 }
 0x191   : > { %v835_v17 = vpop.permute.xlu1 %834  ;;  %v717_v18 = vpop.permute.xlu0 %716 }
 0x192   : > { %1413 = vmatmul.mubr.msk.bf16.vlgmr.msra.gmra.mrb[0].mxu1 %vm491_vm2, %v1878_v6  ;;  %v840_v19 = vsel %vm491_vm2, %v835_v17, 0 }
 0x193   : > { %1423 = vmatpush3.bf16.xpose.msra.mxu1 %v608_v14  ;;  %1424 = vmatprep.mubr.msk.bf16.mxu1 %vm1688_vm0, %v1687_v0 }
 0x194   : > { %1434 = vmatprep.subr.bf16.mxu1 %v1687_v0 }
 0x195   : > { %v833_v20 = vpop.permute.xlu0 %832 }
 0x19a   : > { %1425 = vmatmul.mubr.msk.bf16.vlgmr.msra.gmra.mrb[4].mxu1 %vm491_vm2, %v601_v13 }
 0x19b   : > { %1435 = vmatpush3.bf16.xpose.msra.mxu1 %v724_v16  ;;  %1436 = vmatprep.mubr.msk.bf16.mxu1 %vm1688_vm0, %v1687_v0 }
 0x19c   : > { %1446 = vmatprep.subr.bf16.mxu1 %v1687_v0 }
 0x1a2   : > { %1437 = vmatmul.mubr.msk.bf16.vlgmr.msra.gmra.mrb[8].mxu1 %vm491_vm2, %v717_v18 }
 0x1a3   : > { %1447 = vmatpush3.bf16.xpose.msra.mxu1 %v840_v19  ;;  %1448 = vmatprep.mubr.msk.bf16.mxu1 %vm1688_vm0, %v1687_v0 }
 0x1a4   : > { %1458 = vmatprep.subr.bf16.mxu1 %v1687_v0 }
 0x1aa   : > { %1449 = vmatmul.mubr.msk.bf16.vlgmr.msra.gmra.mrb[12].mxu1 %vm491_vm2, %v833_v20 }
 0x1ab   : > { %1462 = vmatprep.mubr.msk.bf16.mxu1 %vm1688_vm0, %v1687_v0 }
 0x265   : > { %v532_v21 = vpop.f32.mrb[0].mxu1 }
 0x266   : > { %v1414_v22 = vpop.f32.mrb[1].mxu1  ;;  %v538_v23 = vsel %vm491_vm2, %v532_v21, -inf }
 0x267   : > { %539 = vmax.xlane.f32.xlu1 %v538_v23  ;;  %v535_v24 = vpop.f32.mrb[2].mxu1 }
 0x268   : > { %v1415_v25 = vpop.f32.mrb[3].mxu1 }
 0x26d   : > { %v644_v26 = vpop.f32.mrb[4].mxu1 }
 0x26e   : > { %v1426_v27 = vpop.f32.mrb[5].mxu1  ;;  %v650_v28 = vsel %vm491_vm2, %v644_v26, -inf }
 0x26f   : > { %651 = vmax.xlane.f32.xlu0 %v650_v28  ;;  %v647_v29 = vpop.f32.mrb[6].mxu1 }
 0x270   : > { %v1427_v30 = vpop.f32.mrb[7].mxu1 }
 0x275   : > { %v760_v31 = vpop.f32.mrb[8].mxu1 }
 0x276   : > { %v1438_v32 = vpop.f32.mrb[9].mxu1  ;;  %v766_v33 = vsel %vm491_vm2, %v760_v31, -inf }
 0x277   : > { %767 = vmax.xlane.f32.xlu0 %v766_v33  ;;  %v763_v34 = vpop.f32.mrb[10].mxu1  ;;  %v1557_v32 = vld [vmem:[%s2045_s2 + $0x8] sm:$0xff]  }
 0x278   : > { %v1439_v35 = vpop.f32.mrb[11].mxu1 }
 0x27d   : > { %v876_v36 = vpop.f32.mrb[12].mxu1 }
 0x27e   : > { %v1450_v37 = vpop.f32.mrb[13].mxu1  ;;  %v882_v38 = vsel %vm491_vm2, %v876_v36, -inf }
 0x27f   : > { %883 = vmax.xlane.f32.xlu1 %v882_v38  ;;  %v879_v39 = vpop.f32.mrb[14].mxu1 }
 0x280   : > { %v1451_v40 = vpop.f32.mrb[15].mxu1 }
 0x2f4   : > { %v540_v41 = vpop.xlane.xlu1 %539 }
 0x2f5   : > { %v541_v42 = vsub.f32 %v532_v21, %v540_v41 }
 0x2f7   : > { %v542_v43 = vmul.f32 1.442695, %v541_v42 }
 0x2f9   : > { %1564 = vpow2.f32 %v542_v43 }
 0x2fc   : > { %v652_v44 = vpop.xlane.xlu0 %651 }
 0x2fd   : > { %v653_v45 = vsub.f32 %v644_v26, %v652_v44 }
 0x2ff   : > { %v654_v46 = vmul.f32 1.442695, %v653_v45 }
 0x301   : > { %1566 = vpow2.f32 %v654_v46  ;;  %v1350_v46 = vld [vmem:[%s2046_s3] ss:$0 sm:$0xff] }
 0x303   : > { %v1565_v47 = vpop.eup %1564 }
 0x304   : > { %v768_v48 = vpop.xlane.xlu0 %767  ;;  %v544_v49 = vsel %vm491_vm2, %v1565_v47, 0.0 }
 0x305   : > { %v769_v50 = vsub.f32 %v760_v31, %v768_v48  ;;  %545 = vadd.xlane.f32.xlu0 %v544_v49  ;;  %v1556_v31 = vld [vmem:[%s2045_s2] sm:$0xff]  }
 0x306   : > { %1459 = vmatpush3.bf16.msra.mxu1 %v1556_v31 }
 0x307   : > { %v770_v51 = vmul.f32 1.442695, %v769_v50  ;;  %1460 = vmatprep.subr.bf16.mxu1 %v1687_v0 }
 0x309   : > { %1568 = vpow2.f32 %v770_v51 }
 0x30a   : > { %1461 = vmatpush3.bf16.msra.mxu1 %v1557_v32 }
 0x30b   : > { %v1567_v52 = vpop.eup %1566  ;;  %1474 = vmatprep.subr.bf16.mxu1 %v1687_v0 }
 0x30c   : > { %v656_v53 = vsel %vm491_vm2, %v1567_v52, 0.0  ;;  %v884_v56 = vpop.xlane.xlu1 %883 }
 0x30d   : > { %657 = vadd.xlane.f32.xlu1 %v656_v53  ;;  %v885_v57 = vsub.f32 %v876_v36, %v884_v56 }
 0x30f   : > { %v886_v58 = vmul.f32 1.442695, %v885_v57 }
 0x311   : > { %1570 = vpow2.f32 %v886_v58 }
 0x313   : > { %v1569_v54 = vpop.eup %1568 }
 0x314   : > { %v772_v55 = vsel %vm491_vm2, %v1569_v54, 0.0 }
 0x315   : > { %773 = vadd.xlane.f32.xlu0 %v772_v55 }
 0x31b   : > { %v1571_v59 = vpop.eup %1570 }
 0x31c   : > { %v888_v60 = vsel %vm491_vm2, %v1571_v59, 0.0 }
 0x31e   : > { %662 = vrot.lane.b32.xlu1 %v1878_v6, %s1696_s26 }
 0x32b   : > { %550 = vrot.lane.b32.xlu0 %v1878_v6, %s1697_s16 }
 0x32f   : > { %894 = vrot.lane.b32.xlu0 %v1878_v6, %s1698_s19  ;;  %s1369_s19 = sshll.u32 %s1790_s25, 7  ;;  %s1703_s25 = smov [#allocation6]  }
 0x330   : > { %s2000_s0 = scalar_lea.hbm %s2055_s12, %s1369_s19 }
 0x342   : > { %889 = vadd.xlane.f32.xlu1 %v888_v60  ;;  %v1559_v60 = vld [vmem:[#allocation3 + $0x8] sm:$0xff]  }
 0x353   : > { %778 = vrot.lane.b32.xlu1 %v1878_v6, %s1699_s20  ;;  %s419_s20 = scalar_lea.vmem [#allocation6], %s1337_s15  ;;  %s1620_s15 = sshll.u32 %s1703_s25, 4  ;;  %s1621_s15 = int_to_ptr.vmem [resolvable:$false] %s1620_s15 }
 0x354   : > { %s1622_s26 = scalar_lea.vmem %s1621_s15, 256 }
 0x392   : > { %v546_v61 = vpop.xlane.xlu0 %545 }
 0x393   : > { %1572 = vrcp.f32 %v546_v61  ;;  %v1561_v61 = vld [vmem:[%s2051_s8 + $0x8] sm:$0xff]  }
 0x39a   : > { %v658_v62 = vpop.xlane.xlu1 %657 }
 0x39b   : > { %1574 = vrcp.f32 %v658_v62 }
 0x39d   : > { %v1573_v63 = vpop.eup %1572 }
 0x39e   : > { %v548_v2 = vmul.f32 %v1573_v63, %v1565_v47  ;;  %v663_v7 = vpop.permute.xlu1 %662 }
 0x39f   : > { %v668_v10 = vsel %vm555_vm3, %v663_v7, 0 }
 0x3a0   : > { %v549_v8 = vpack.c.bf16 %v548_v2, %v548_v2 }
 0x3a2   : > { %v774_v1 = vpop.xlane.xlu0 %773 }
 0x3a3   : > { %1576 = vrcp.f32 %v774_v1 }
 0x3a5   : > { %v1575_v9 = vpop.eup %1574 }
 0x3a6   : > { %v551_v4 = vpop.permute.xlu0 %550  ;;  %v660_v6 = vmul.f32 %v1575_v9, %v1567_v52  ;;  %v1354_v9 = vld [vmem:[%s2047_s4] ss:$0 sm:$0xff] }
 0x3a7   : > { %v557_v5 = vsel %vm555_vm3, %v551_v4, 0 }
 0x3a8   : > { %1417 = vmatpush3.bf16.msra.mxu0 %v557_v5  ;;  %v661_v11 = vpack.c.bf16 %v660_v6, %v660_v6 }
 0x3a9   : > { %1428 = vmatprep.subr.bf16.mxu0 %v1687_v0 }
 0x3aa   : > { %v895_v17 = vpop.permute.xlu0 %894 }
 0x3ab   : > { %1419 = vmatmul.mubr.msk.bf16.vlgmr.msra.gmra.mrb[4].mxu0 %vm491_vm2, %v549_v8  ;;  %v900_v19 = vsel %vm555_vm3, %v895_v17, 0  ;;  %v1356_v17 = vld [vmem:[%s2050_s7] ss:$0 sm:$0xff] }
 0x3ac   : > { %1429 = vmatpush3.bf16.msra.mxu0 %v668_v10  ;;  %1430 = vmatprep.mubr.msk.bf16.mxu0 %vm1688_vm0, %v1687_v0 }
 0x3ad   : > { %1440 = vmatprep.subr.bf16.mxu0 %v1687_v0  ;;  %v1577_v12 = vpop.eup %1576 }
 0x3ae   : > { %v776_v14 = vmul.f32 %v1577_v12, %v1569_v54 }
 0x3b0   : > { %v777_v18 = vpack.c.bf16 %v776_v14, %v776_v14 }
 0x3b3   : > { %1431 = vmatmul.mubr.msk.bf16.vlgmr.msra.gmra.mrb[8].mxu0 %vm491_vm2, %v661_v11  ;;  %v1355_v11 = vld [vmem:[%s2048_s5] ss:$0 sm:$0xff] }
 0x3b4   : > { %1442 = vmatprep.mubr.msk.bf16.mxu0 %vm1688_vm0, %v1687_v0 }
 0x3cf   : > { %v890_v13 = vpop.xlane.xlu1 %889 }
 0x3d0   : > { %1578 = vrcp.f32 %v890_v13 }
 0x3d3   : > { %v779_v15 = vpop.permute.xlu1 %778 }
 0x3d4   : > { %v784_v16 = vsel %vm555_vm3, %v779_v15, 0  ;;  %v1562_v15 = vld [vmem:[%s2051_s8 + $0x10] sm:$0xff]  }
 0x3d5   : > { %1441 = vmatpush3.bf16.msra.mxu0 %v784_v16  ;;  %v1563_v16 = vld [vmem:[%s2051_s8 + $0x18] sm:$0xff]  }
 0x3d6   : > { %1452 = vmatprep.subr.bf16.mxu0 %v1687_v0 }
 0x3d8   : > { %1443 = vmatmul.mubr.msk.bf16.vlgmr.msra.gmra.mrb[12].mxu0 %vm491_vm2, %v777_v18 }
 0x3d9   : > { %1453 = vmatpush3.bf16.msra.mxu0 %v900_v19  ;;  %1454 = vmatprep.mubr.msk.bf16.mxu0 %vm1688_vm0, %v1687_v0 }
 0x3da   : > { %v1579_v20 = vpop.eup %1578  ;;  %1466 = vmatprep.subr.bf16.mxu0 %v1687_v0 }
 0x3db   : > { %v892_v21 = vmul.f32 %v1579_v20, %v1571_v59  ;;  %v1558_v59 = vld [vmem:[#allocation3] sm:$0xff]  }
 0x3dd   : > { %v893_v22 = vpack.c.bf16 %v892_v21, %v892_v21 }
 0x3e0   : > { %1455 = vmatmul.mubr.msk.bf16.vlgmr.msra.gmra.mrb[16].mxu0 %vm491_vm2, %v893_v22 }
 0x3e1   : > { %1470 = vmatprep.mubr.msk.bf16.mxu0 %vm1688_vm0, %v1687_v0  ;;  %1467 = vmatpush3.bf16.msra.mxu0 %v1558_v59 }
 0x3e2   : > { %1468 = vmatprep.subr.bf16.mxu0 %v1687_v0 }
 0x3e5   : > { %1469 = vmatpush3.bf16.msra.mxu0 %v1559_v60 }
 0x47e   : > { %v593_v23 = vpop.f32.mrb[4].mxu0 }
 0x47f   : > { %599 = vst.msk [vmem:[#allocation2] sm:$0xff] %vm491_vm2, %v593_v23  ;;  %v1420_v24 = vpop.f32.mrb[5].mxu0 }
 0x480   : > { %v596_v25 = vpop.f32.mrb[6].mxu0 }
 0x481   : > { %v1421_v26 = vpop.f32.mrb[7].mxu0 }
 0x486   : > { %v704_v27 = vpop.f32.mrb[8].mxu0 }
 0x487   : > { %711 = vrot.lane.b32.xlu1 %v704_v27, %s1700_s28  ;;  %v1432_v28 = vpop.f32.mrb[9].mxu0  ;;  %s1260_s28 = sshll.u32 %s419_s20, 4  ;;  %s2002_s28 = int_to_ptr.vmem [resolvable:$true] %s1260_s28 }
 0x488   : > { %v707_v29 = vpop.f32.mrb[10].mxu0  ;;  %p1623_p2 = scmp.lt.s32.totalorder %s2002_s28, %s1621_s15 }
 0x489   : > { %v1433_v30 = vpop.f32.mrb[11].mxu0 }
 0x4ab   : > { %v820_v33 = vpop.f32.mrb[12].mxu0 }
 0x4ac   : > { %827 = vrot.lane.b32.xlu0 %v820_v33, %s1701_s17  ;;  %v1444_v34 = vpop.f32.mrb[13].mxu0  ;;  %s1247_s17 = scalar_lea.sflag [#allocation5], %s417_s30 }
 0x4ad   : > { %v823_v35 = vpop.f32.mrb[14].mxu0 }
 0x4ae   : > { %v1445_v36 = vpop.f32.mrb[15].mxu0 }
 0x4b3   : > { %v936_v37 = vpop.f32.mrb[16].mxu0 }
 0x4b4   : > { %943 = vrot.lane.b32.xlu1 %v936_v37, %s1702_s18  ;;  %v1456_v38 = vpop.f32.mrb[17].mxu0  ;;  %s1616_s18 = scalar_lea.vmem %s2002_s28, 128 }
 0x4b5   : > { %v939_v39 = vpop.f32.mrb[18].mxu0  ;;  %p1617_p6 = scmp.ne.s32.totalorder %s2002_s28, %s1616_s18  ;;  %p1624_p3 = scmp.lt.s32.totalorder %s1622_s26, %s1616_s18 }
 0x4b6   : > { %v1457_v40 = vpop.f32.mrb[19].mxu0 }
 0x4b7   : > { %p1618_p10 = pnand %p1617_p6, %p2071_p9  ;;  %p1625_p4 = por %p1624_p3, %p1623_p2 }
 0x4b9   : > { %p1619_p12 = pneg %p1618_p10 }
 0x4bb   : > { %p1626_p7 = pnand %p1625_p4, %p1619_p12 }
 0x4f9   : > { %v712_v41 = vpop.permute.xlu1 %711 }
 0x4fa   : > { %715 = vst.msk [vmem:[#allocation2] sm:$0xff] %vm714_vm4, %v712_v41 }
 0x51e   : > { %v828_v42 = vpop.permute.xlu0 %827 }
 0x51f   : > { %831 = vst.msk [vmem:[#allocation2] sm:$0xff] %vm830_vm5, %v828_v42 }
 0x526   : > { %v944_v43 = vpop.permute.xlu1 %943 }
 0x527   : > { %947 = vst.msk [vmem:[#allocation2] sm:$0xff] %vm946_vm6, %v944_v43 }
 0x52e   : > { %v948_v44 = vld [vmem:[#allocation2] sm:$0xff] }
 0x52f   : > { %v949_v45 = vpack.c.bf16 %v948_v44, %v948_v44 }
 0x531   : > { %1463 = vmatmul.mubr.msk.bf16.vlgmr.msra.gmra.mrb[16].mxu1 %vm443_vm1, %v949_v45  ;;  %v1366_v45 = vld [vmem:[%s2053_s10] ss:$0 sm:$0xff] }
 0x532   : > { %1482 = vmatprep.mubr.msk.bf16.mxu1 %vm1688_vm0, %v1687_v0 }
 0x604   : > { %v1010_v47 = vpop.f32.mrb[16].mxu1 }
 0x605   : > { %v1011_v48 = vadd.f32 %v1350_v46, %v1010_v47  ;;  %v1464_v49 = vpop.f32.mrb[17].mxu1 }
 0x606   : > { %v1013_v50 = vpop.f32.mrb[18].mxu1 }
 0x607   : > { %v1465_v51 = vpop.f32.mrb[19].mxu1  ;;  %v1016_v52 = vadd.f32 %v1011_v48, %v1869_v3  ;;  %v1560_v3 = vld [vmem:[%s2051_s8] sm:$0xff]  }
 0x608   : > { %1475 = vmatpush3.bf16.msra.mxu1 %v1560_v3  ;;  %v1367_v48 = vld [vmem:[%s2054_s11] ss:$0 sm:$0xff] }
 0x609   : > { %v1017_v53 = vsel %vm443_vm1, %v1016_v52, 0.0  ;;  %1476 = vmatprep.subr.bf16.mxu1 %v1687_v0 }
 0x60a   : > { %1018 = vadd.xlane.f32.xlu0 %v1017_v53 }
 0x60c   : > { %1477 = vmatpush3.bf16.msra.mxu1 %v1561_v61 }
 0x60d   : > { %1478 = vmatprep.subr.bf16.mxu1 %v1687_v0 }
 0x610   : > { %1479 = vmatpush3.bf16.msra.mxu1 %v1562_v15 }
 0x611   : > { %1480 = vmatprep.subr.bf16.mxu1 %v1687_v0  ;;  %v1360_v0 = vld [vmem:[%s2052_s9] ss:$0 sm:$0xff] }
 0x614   : > { %1481 = vmatpush3.bf16.msra.mxu1 %v1563_v16 }
 0x697   : > { %v1019_v54 = vpop.xlane.xlu0 %1018 }
 0x698   : > { %v1021_v55 = vmul.f32 0.03125, %v1019_v54 }
 0x69a   : > { %v1022_v56 = vsub.f32 %v1016_v52, %v1021_v55 }
 0x69c   : > { %v1023_v57 = vmul.f32 %v1022_v56, %v1022_v56  ;;  %v1042_v10 = vmul.f32 %v1354_v9, %v1022_v56 }
 0x69e   : > { %v1024_v58 = vsel %vm443_vm1, %v1023_v57, 0.0 }
 0x69f   : > { %1025 = vadd.xlane.f32.xlu1 %v1024_v58 }
 0x72c   : > { %v1026_v62 = vpop.xlane.xlu1 %1025 }
 0x72d   : > { %v1027_v63 = vmul.f32 0.032258064, %v1026_v62 }
 0x72f   : > { %1580 = vrsqrt.f32 %v1027_v63  ;;  %vm1030_vm7 = vcmp.eq.f32.partialorder %v1027_v63, inf  ;;  %v1033_v4 = vand.u32 2147483648, %v1027_v63  ;;  %vm1032_vm8 = vcmp.eq.f32.partialorder %v1027_v63, 0.0 }
 0x739   : > { %v1581_v1 = vpop.eup %1580 }
 0x73a   : > { %v1029_v2 = vmul.f32 %v1581_v1, %v1027_v63 }
 0x73c   : > { %v1031_v5 = vsel %vm1030_vm7, %v1027_v63, %v1029_v2 }
 0x73d   : > { %v1034_v7 = vsel %vm1032_vm8, %v1033_v4, %v1031_v5 }
 0x73e   : > { %v1043_v8 = vadd.f32 1e-06, %v1034_v7 }
 0x740   : > { %1582 = vrcp.f32 %v1043_v8 }
 0x74a   : > { %v1583_v6 = vpop.eup %1582 }
 0x74b   : > { %v1046_v12 = vmul.f32 %v1583_v6, %v1042_v10 }
 0x74d   : > { %v1054_v13 = vadd.f32 %v1355_v11, %v1046_v12 }
 0x74f   : > { %v1055_v14 = vpack.c.bf16 %v1054_v13, %v1054_v13 }
 0x751   : > { %1471 = vmatmul.mubr.msk.bf16.vlgmr.msra.gmra.mrb[20].mxu0 %vm443_vm1, %v1055_v14 }
 0x824   : > { %v1116_v18 = vpop.f32.mrb[20].mxu0 }
 0x825   : > { %v1117_v19 = vadd.f32 %v1356_v17, %v1116_v18  ;;  %v1472_v20 = vpop.f32.mrb[21].mxu0 }
 0x826   : > { %v1119_v21 = vpop.f32.mrb[22].mxu0 }
 0x827   : > { %v1122_v22 = vmax.f32 %v1117_v19, 0.0  ;;  %v1473_v23 = vpop.f32.mrb[23].mxu0 }
 0x829   : > { %v1123_v24 = vpack.c.bf16 %v1122_v22, %v1122_v22 }
 0x82b   : > { %1483 = vmatmul.mubr.msk.bf16.vlgmr.msra.gmra.mrb[20].mxu1 %vm1163_vm9, %v1123_v24 }
 0x8fe   : > { %v1201_v25 = vpop.f32.mrb[20].mxu1 }
 0x8ff   : > { %v1202_v26 = vadd.f32 %v1360_v0, %v1201_v25  ;;  %v1484_v27 = vpop.f32.mrb[21].mxu1 }
 0x900   : > { %v1204_v28 = vpop.f32.mrb[22].mxu1 }
 0x901   : > { %v1485_v29 = vpop.f32.mrb[23].mxu1  ;;  %v1207_v30 = vadd.f32 %v1202_v26, %v1054_v13 }
 0x903   : > { %v1208_v31 = vsel %vm443_vm1, %v1207_v30, 0.0 }
 0x904   : > { %1209 = vadd.xlane.f32.xlu0 %v1208_v31 }
 0x991   : > { %v1210_v32 = vpop.xlane.xlu0 %1209 }
 0x992   : > { %v1211_v33 = vmul.f32 0.03125, %v1210_v32 }
 0x994   : > { %v1212_v34 = vsub.f32 %v1207_v30, %v1211_v33 }
 0x996   : > { %v1213_v35 = vmul.f32 %v1212_v34, %v1212_v34  ;;  %v1232_v46 = vmul.f32 %v1366_v45, %v1212_v34 }
 0x998   : > { %v1214_v36 = vsel %vm443_vm1, %v1213_v35, 0.0 }
 0x999   : > { %1215 = vadd.xlane.f32.xlu0 %v1214_v36 }
 0xa26   : > { %v1216_v37 = vpop.xlane.xlu0 %1215 }
 0xa27   : > { %v1217_v38 = vmul.f32 0.032258064, %v1216_v37 }
 0xa29   : > { %1584 = vrsqrt.f32 %v1217_v38  ;;  %vm1220_vm10 = vcmp.eq.f32.partialorder %v1217_v38, inf  ;;  %v1223_v41 = vand.u32 2147483648, %v1217_v38  ;;  %vm1222_vm11 = vcmp.eq.f32.partialorder %v1217_v38, 0.0 }
 0xa33   : > { %v1585_v39 = vpop.eup %1584 }
 0xa34   : > { %v1219_v40 = vmul.f32 %v1585_v39, %v1217_v38 }
 0xa36   : > { %v1221_v42 = vsel %vm1220_vm10, %v1217_v38, %v1219_v40 }
 0xa37   : > { %v1224_v43 = vsel %vm1222_vm11, %v1223_v41, %v1221_v42 }
 0xa38   : > { %v1233_v44 = vadd.f32 1e-06, %v1224_v43 }
 0xa3a   : > { %1586 = vrcp.f32 %v1233_v44 }
 0xa44   : > { %v1587_v47 = vpop.eup %1586 }
 0xa45   : > { %v1236_v49 = vmul.f32 %v1587_v47, %v1232_v46 }
 0xa47   : > { %v1244_v50 = vadd.f32 %v1367_v48, %v1236_v49 }
 0xa49   : > { %1245 = vst.msk [vmem:[%s419_s20] sm:$0xff] %vm443_vm1, %v1244_v50 }
 0xa4a   : > { %1629 = shalt.err (!%p1626_p7)
}
 0xa4b   : > { %s1630_s30 = scalar_lea.hbm %s2000_s0, 128  ;;  %s1634_s20 = scalar_lea.hbm %s2055_s12, 256 }
 0xa4c   : > { %p1631_p8 = scmp.ne.s32.totalorder %s2000_s0, %s1630_s30  ;;  %p1635_p1 = scmp.lt.u32.totalorder %s2000_s0, %s2055_s12 }
 0xa4d   : > { %p1636_p0 = scmp.lt.u32.totalorder %s1634_s20, %s1630_s30  ;;  %p1638_p6 = scmp.lt.u32.totalorder %s1630_s30, %s2000_s0 }
 0xa4e   : > { %p1632_p11 = pnand %p1631_p8, %p2071_p9 }
 0xa4f   : > { %p1637_p5 = por %p1636_p0, %p1635_p1 }
 0xa50   : > { %p1633_p13 = pneg %p1632_p11 }
 0xa51   : > { %p1639_p10 = por %p1638_p6, %p1637_p5 }
 0xa53   : > { %p1640_p12 = pnand %p1639_p10, %p1633_p13 }
 0xa55   : > { %1643 = shalt.err (!%p1640_p12)
}
 0xa56   : > { %1490 = dma.vmem_to_hbm [thread:$0]  (%p2071_p9), %s2002_s28, 128, %s2000_s0, %s1247_s17  }
 0xa57 PF: > { %p1502_p2 = scmp.ge.s32.totalorder %s1682_s24, 2  ;;  %s1272_s18 = sand.u32 1, %s1670_s21  }
 0xa58   : > { %p2072_p3 = scmp.ne.s32.totalorder %s2064_s14, 0  ;;  %s1273_s25 = scalar_lea.sflag [#allocation5], %s1272_s18 }
 0xa5a   : > { %p1497_p4 = pnand %p1502_p2, %p2072_p3 }
 0xa5c   : > { %1665 = dma.done.wait (!%p1497_p4), %s1273_s25, 128  }
 0xa5d   : > { %1667 = vsyncadd (!%p1497_p4), %s1273_s25, 4294967168  ;;  %s2073_s15 = sld [smem:[#allocation9_spill]]  ;;  %s2074_s23 = sld [smem:[#allocation10_spill]] }
 0xa5e   : > { %p23_p7 = scmp.ge.s32.totalorder %s1794_s27, 4   ;;  %s2075_s21 = smov %s1674_s22 }
 0xa5f   : > { %s2077_s24 = smov %s1794_s27 }
 0xa60   :  { %25 = sbr.rel (!%p23_p7) target bundleno = 6 (0x6), region = 108 }
 0xa63   : > { %s2076_s22 = smov %s2073_s15 }
 0xa67   :  { %1278 = vsyncpa [#allocation4], 1 }
 0xa68   :  { %1280 = vsyncpa [#allocation4 + $0x1], 1 }
 0xa69   :  { %1281 = vsyncpa [#allocation5], 1 }
 0xa6a   :  { %1283 = vsyncpa [#allocation5 + $0x1], 1 }

</bundles_post_ra>
